<compile_context>
chip_gen: v5e
topology: v5e:2x2
jax: 0.10.0
libtpu: 0.0.40
codegen_flags: <defaults>
</compile_context>

<pallas_src>
import functools

import jax
import jax.numpy as jnp
from jax import lax
from jax.experimental import pallas as pl
from jax.experimental.pallas import tpu as pltpu

_SUBLANE = 8       # f32 sublane width: batch is padded to a multiple of this
_TIME_CHUNK = 32   # max timesteps handled per grid step


def _lstm_decoder_kernel(
    gin_ref,    # (T_c, Bp, 4H)  precomputed layer-0 input gates: x @ Wih0 + b0
    h0_ref,     # (L, Bp, H)     initial hidden (from encoder)
    c0_ref,     # (L, Bp, H)     initial cell
    whh0_ref,   # (H, 4H)        layer-0 recurrent weight
    w1_ref,     # (2H, 4H)       layer-1 fused weight [Wih1; Whh1]
    b1_ref,     # (1, 4H)        layer-1 bias (b_ih + b_hh)
    out_ref,    # (T_c, Bp, H)   time-major output chunk
    hN_ref,     # (L, Bp, H)     final hidden
    cN_ref,     # (L, Bp, H)     final cell
    h_sc,       # VMEM (L, Bp, H) f32 -- carries state across chunks
    c_sc,       # VMEM (L, Bp, H) f32
    *,
    seqlen,      # true (unpadded) sequence length, static
    time_chunk,  # timesteps per grid step, static
):
    chunk = pl.program_id(0)
    H = hN_ref.shape[-1]
    f32 = jnp.float32
    need_mask = (seqlen % time_chunk) != 0   # static Python bool

    @pl.when(chunk == 0)
    def _():
        h_sc[...] = h0_ref[...].astype(f32)
        c_sc[...] = c0_ref[...].astype(f32)

    # Weights are constant-index blocks: resident in VMEM for the whole kernel.
    whh0 = whh0_ref[...]
    w1 = w1_ref[...]
    b1 = b1_ref[...]

    def cell(gates, c_prev):
        # PyTorch LSTM gate order [i, f, g, o].  At H < 128 these lane slices
        # cost a few XLU shifts per step; they become free tile selections
        # once H is a multiple of 128.
        i_g = jax.nn.sigmoid(gates[:, 0 * H:1 * H])
        f_g = jax.nn.sigmoid(gates[:, 1 * H:2 * H])
        g_g = jnp.tanh(gates[:, 2 * H:3 * H])
        o_g = jax.nn.sigmoid(gates[:, 3 * H:4 * H])
        c_new = f_g * c_prev + i_g * g_g
        h_new = o_g * jnp.tanh(c_new)
        return h_new, c_new

    def step(t, carry):
        h0p, c0p, h1p, c1p = carry
        # Layer 0: input projection was hoisted out of the recurrence, so only
        # the recurrent matmul remains on the serial critical path.
        g0 = gin_ref[t] + jnp.dot(h0p, whh0, preferred_element_type=f32)
        h0n, c0n = cell(g0, c0p)
        # Layer 1: single fused input+recurrent MXU push.
        x1 = jnp.concatenate([h0n, h1p], axis=-1)              # (Bp, 2H)
        g1 = jnp.dot(x1, w1, preferred_element_type=f32) + b1
        h1n, c1n = cell(g1, c1p)
        out_ref[t] = h1n.astype(out_ref.dtype)
        if need_mask:
            # Only traced when seqlen was padded to a multiple of time_chunk:
            # padded tail steps must not advance the recurrent state.
            valid = (chunk * time_chunk + t) < seqlen
            h0n = jnp.where(valid, h0n, h0p)
            c0n = jnp.where(valid, c0n, c0p)
            h1n = jnp.where(valid, h1n, h1p)
            c1n = jnp.where(valid, c1n, c1p)
        return h0n, c0n, h1n, c1n

    carry0 = (h_sc[0], c_sc[0], h_sc[1], c_sc[1])
    h0f, c0f, h1f, c1f = lax.fori_loop(0, time_chunk, step, carry0, unroll=True)

    # Persist state for the next chunk (cheap; tiny tiles).
    h_sc[0] = h0f
    h_sc[1] = h1f
    c_sc[0] = c0f
    c_sc[1] = c1f

    @pl.when(chunk == pl.num_programs(0) - 1)
    def _():
        hN_ref[0] = h0f.astype(hN_ref.dtype)
        hN_ref[1] = h1f.astype(hN_ref.dtype)
        cN_ref[0] = c0f.astype(cN_ref.dtype)
        cN_ref[1] = c1f.astype(cN_ref.dtype)


@jax.jit
def rnn_decoder_forward(xs, enc_out, enc_hidden_h, enc_hidden_c, attn_mask, params):
    """Forward pass of RNNDecoder (attn_type='none', attn_time='pre', eval mode).

    xs:            (bsz, seqlen) int32 token ids
    enc_out:       (bsz, srclen, H)   -- unused (attn 'none'), kept for signature parity
    enc_hidden_h:  (bsz, L, H) batch-first hidden from encoder
    enc_hidden_c:  (bsz, L, H) batch-first cell   from encoder
    attn_mask:     unused
    returns: output (bsz, seqlen, H), (h (bsz, L, H), c (bsz, L, H))
    """
    del enc_out, attn_mask
    emb = params["embedding"]                       # (vocab, esz), row 0 == padding zeros
    bsz, seqlen = xs.shape
    L = enc_hidden_h.shape[1]
    H = enc_hidden_h.shape[2]
    esz = emb.shape[1]
    assert L == 2, "kernel is specialized to the module default numlayers=2"

    t_c = min(_TIME_CHUNK, seqlen)                  # timesteps per grid step
    nchunks = pl.cdiv(seqlen, t_c)
    s_pad = nchunks * t_c
    b_pad = ((bsz + _SUBLANE - 1) // _SUBLANE) * _SUBLANE

    # --- glue: embedding lookup (gather), produced directly time-major so no
    # large transpose is materialized; dropout = identity in eval mode. ---
    xes_tm = jnp.take(emb, xs.T, axis=0)            # (seqlen, bsz, esz)

    # Hoisted layer-0 input projection: one big (S*B, esz) x (esz, 4H) matmul,
    # layer-0 bias (b_ih + b_hh) folded in.
    gin0 = xes_tm.reshape(seqlen * bsz, esz) @ params["wih0"] + params["b0"]
    gin0 = gin0.reshape(seqlen, bsz, 4 * H)
    gin0 = jnp.pad(gin0, ((0, s_pad - seqlen), (0, b_pad - bsz), (0, 0)))

    # _transpose_hidden_state: batch-first -> layer-first (tiny: L x bsz x H),
    # and pad batch to the sublane width.
    h0 = jnp.pad(jnp.transpose(enc_hidden_h, (1, 0, 2)),
                 ((0, 0), (0, b_pad - bsz), (0, 0)))
    c0 = jnp.pad(jnp.transpose(enc_hidden_c, (1, 0, 2)),
                 ((0, 0), (0, b_pad - bsz), (0, 0)))

    # Layer-1 fused weight: stack input and recurrent weights on the K dim.
    w1 = jnp.concatenate([params["wih1"], params["whh1"]], axis=0)   # (2H, 4H)

    kernel = functools.partial(_lstm_decoder_kernel, seqlen=seqlen, time_chunk=t_c)
    full = lambda *shape: pl.BlockSpec(shape, lambda c: (0,) * len(shape))

    out_tm, hN, cN = pl.pallas_call(
        kernel,
        out_shape=(
            jax.ShapeDtypeStruct((s_pad, b_pad, H), jnp.float32),
            jax.ShapeDtypeStruct((L, b_pad, H), jnp.float32),
            jax.ShapeDtypeStruct((L, b_pad, H), jnp.float32),
        ),
        grid_spec=pltpu.PrefetchScalarGridSpec(
            num_scalar_prefetch=0,
            grid=(nchunks,),
            in_specs=[
                pl.BlockSpec((t_c, b_pad, 4 * H), lambda c: (c, 0, 0)),  # gin0 chunk
                full(L, b_pad, H),              # h0 (read once, chunk 0)
                full(L, b_pad, H),              # c0
                full(H, 4 * H),                 # whh0
                full(2 * H, 4 * H),             # w1 = [wih1; whh1]
                full(1, 4 * H),                 # b1
            ],
            out_specs=[
                pl.BlockSpec((t_c, b_pad, H), lambda c: (c, 0, 0)),      # out chunk
                full(L, b_pad, H),              # h final
                full(L, b_pad, H),              # c final
            ],
            scratch_shapes=[
                pltpu.VMEM((L, b_pad, H), jnp.float32),
                pltpu.VMEM((L, b_pad, H), jnp.float32),
            ],
        ),
        compiler_params=pltpu.CompilerParams(
            dimension_semantics=("arbitrary",),   # time recurrence is serial
        ),
    )(gin0, h0, c0, params["whh0"], w1, params["b1"])

    # Back to the PyTorch batch-first convention; drop batch/time padding.
    output = jnp.transpose(out_tm[:seqlen, :bsz], (1, 0, 2))    # (bsz, seqlen, H)
    h_out = jnp.transpose(hN[:, :bsz], (1, 0, 2))               # (bsz, L, H)
    c_out = jnp.transpose(cN[:, :bsz], (1, 0, 2))               # (bsz, L, H)
    return output, (h_out, c_out)


def _reference_forward(xs, enc_hidden_h, enc_hidden_c, params):
    """Pure-JAX reference (lax.scan LSTM) for correctness check."""
    emb = params["embedding"]
    xes = jnp.take(emb, xs, axis=0)                 # (bsz, seqlen, esz)
    h0 = jnp.transpose(enc_hidden_h, (1, 0, 2))
    c0 = jnp.transpose(enc_hidden_c, (1, 0, 2))
    H = h0.shape[-1]
    layer_w = [(params["wih0"], params["whh0"], params["b0"][0]),
               (params["wih1"], params["whh1"], params["b1"][0])]

    def step(carry, x_t):
        h, c = carry
        inp = x_t
        new_h, new_c = [], []
        for l, (wih, whh, b) in enumerate(layer_w):
            g = inp @ wih + h[l] @ whh + b
            i = jax.nn.sigmoid(g[:, 0 * H:1 * H])
            f = jax.nn.sigmoid(g[:, 1 * H:2 * H])
            gg = jnp.tanh(g[:, 2 * H:3 * H])
            o = jax.nn.sigmoid(g[:, 3 * H:4 * H])
            cn = f * c[l] + i * gg
            hn = o * jnp.tanh(cn)
            new_h.append(hn)
            new_c.append(cn)
            inp = hn
        return (jnp.stack(new_h), jnp.stack(new_c)), inp

    (hN, cN), outs = jax.lax.scan(step, (h0, c0), jnp.transpose(xes, (1, 0, 2)))
    return (jnp.transpose(outs, (1, 0, 2)),
            (jnp.transpose(hN, (1, 0, 2)), jnp.transpose(cN, (1, 0, 2))))


if __name__ == "__main__":
    # Small, module-consistent shapes
    VOCAB, ESZ, HSZ, L = 50, 32, 32, 2
    BSZ, SEQLEN, SRCLEN = 2, 8, 8
    PADDING_IDX = 0

    key = jax.random.PRNGKey(0)
    ks = jax.random.split(key, 12)
    scale = 1.0 / jnp.sqrt(HSZ)

    embedding = jax.random.normal(ks[0], (VOCAB, ESZ), jnp.float32) * 0.1
    embedding = embedding.at[PADDING_IDX].set(0.0)  # padding_idx row zeroed

    def u(k, shape):
        return jax.random.uniform(k, shape, jnp.float32, -scale, scale)

    params = {
        "embedding": embedding,
        # PyTorch stores (4H, in); we pre-transpose to (in, 4H)
        "wih0": u(ks[1], (ESZ, 4 * HSZ)),
        "whh0": u(ks[2], (HSZ, 4 * HSZ)),
        "b0":   (u(ks[3], (1, 4 * HSZ)) + u(ks[4], (1, 4 * HSZ))),  # b_ih + b_hh
        "wih1": u(ks[5], (HSZ, 4 * HSZ)),
        "whh1": u(ks[6], (HSZ, 4 * HSZ)),
        "b1":   (u(ks[7], (1, 4 * HSZ)) + u(ks[8], (1, 4 * HSZ))),
    }

    xs = jax.random.randint(ks[9], (BSZ, SEQLEN), 1, VOCAB, dtype=jnp.int32)
    enc_out = jax.random.normal(ks[10], (BSZ, SRCLEN, HSZ), jnp.float32)
    eh = jax.random.normal(ks[11], (BSZ, L, HSZ), jnp.float32) * 0.5
    ec = jax.random.normal(jax.random.PRNGKey(42), (BSZ, L, HSZ), jnp.float32) * 0.5
    attn_mask = jnp.ones((BSZ, SRCLEN), dtype=jnp.bool_)

    out, (h_out, c_out) = rnn_decoder_forward(xs, enc_out, eh, ec, attn_mask, params)
    jax.block_until_ready((out, h_out, c_out))

    # Sanity check vs. pure-JAX reference
    ref_out, (ref_h, ref_c) = _reference_forward(xs, eh, ec, params)
    assert out.shape == (BSZ, SEQLEN, HSZ)
    assert h_out.shape == (BSZ, L, HSZ) and c_out.shape == (BSZ, L, HSZ)
    assert jnp.allclose(out, ref_out, atol=5e-5, rtol=5e-5)
    assert jnp.allclose(h_out, ref_h, atol=5e-5, rtol=5e-5)
    assert jnp.allclose(c_out, ref_c, atol=5e-5, rtol=5e-5)

    print("KERNEL_OK")
</pallas_src>

<mosaic_0001>
module attributes {stable_mosaic.version = 11 : i64} {
  func.func @_lstm_decoder_kernel(%arg0: i32, %arg1: memref<8x8x128xf32, #tpu.memory_space<vmem>>, %arg2: memref<2x8x32xf32, #tpu.memory_space<vmem>>, %arg3: memref<2x8x32xf32, #tpu.memory_space<vmem>>, %arg4: memref<32x128xf32, #tpu.memory_space<vmem>>, %arg5: memref<64x128xf32, #tpu.memory_space<vmem>>, %arg6: memref<1x128xf32, #tpu.memory_space<vmem>>, %arg7: memref<8x8x32xf32, #tpu.memory_space<vmem>>, %arg8: memref<2x8x32xf32, #tpu.memory_space<vmem>>, %arg9: memref<2x8x32xf32, #tpu.memory_space<vmem>>, %arg10: memref<2x8x32xf32, #tpu.memory_space<vmem>>, %arg11: memref<2x8x32xf32, #tpu.memory_space<vmem>>) attributes {dimension_semantics = [#tpu.dimension_semantics<arbitrary>], iteration_bounds = array<i64: 1>, scalar_prefetch = 0 : i64, scratch_operands = 2 : i64, tpu.core_type = #tpu.core_type<tc>, window_params = [{transform_indices = @transform_0, window_bounds = array<i64: 8, 8, 128>}, {pipeline_mode = #tpu.pipeline_mode<synchronous>, transform_indices = @transform_1, window_bounds = array<i64: 2, 8, 32>}, {pipeline_mode = #tpu.pipeline_mode<synchronous>, transform_indices = @transform_2, window_bounds = array<i64: 2, 8, 32>}, {pipeline_mode = #tpu.pipeline_mode<synchronous>, transform_indices = @transform_3, window_bounds = array<i64: 32, 128>}, {pipeline_mode = #tpu.pipeline_mode<synchronous>, transform_indices = @transform_4, window_bounds = array<i64: 64, 128>}, {pipeline_mode = #tpu.pipeline_mode<synchronous>, transform_indices = @transform_5, window_bounds = array<i64: 1, 128>}, {transform_indices = @transform_6, window_bounds = array<i64: 8, 8, 32>}, {pipeline_mode = #tpu.pipeline_mode<synchronous>, transform_indices = @transform_7, window_bounds = array<i64: 2, 8, 32>}, {pipeline_mode = #tpu.pipeline_mode<synchronous>, transform_indices = @transform_8, window_bounds = array<i64: 2, 8, 32>}]} {
    %c0_i32 = arith.constant 0 : i32
    %0 = arith.cmpi eq, %arg0, %c0_i32 : i32
    %1 = arith.extui %0 : i1 to i32
    %c0_i32_0 = arith.constant 0 : i32
    %2 = arith.cmpi ne, %1, %c0_i32_0 : i32
    scf.if %2 {
      %c0_127 = arith.constant 0 : index
      %c0_128 = arith.constant 0 : index
      %c0_129 = arith.constant 0 : index
      %533 = vector.load %arg2[%c0_127, %c0_128, %c0_129] : memref<2x8x32xf32, #tpu.memory_space<vmem>>, vector<2x8x32xf32>
      %c0_130 = arith.constant 0 : index
      %c0_131 = arith.constant 0 : index
      %c0_132 = arith.constant 0 : index
      %534 = vector.load %arg10[%c0_130, %c0_131, %c0_132] : memref<2x8x32xf32, #tpu.memory_space<vmem>>, vector<2x8x32xf32>
      tpu.vector_store %arg10[%c0_130, %c0_131, %c0_132], %533 {strides = array<i32>} : memref<2x8x32xf32, #tpu.memory_space<vmem>>, vector<2x8x32xf32>,
      %c0_133 = arith.constant 0 : index
      %c0_134 = arith.constant 0 : index
      %c0_135 = arith.constant 0 : index
      %535 = vector.load %arg3[%c0_133, %c0_134, %c0_135] : memref<2x8x32xf32, #tpu.memory_space<vmem>>, vector<2x8x32xf32>
      %c0_136 = arith.constant 0 : index
      %c0_137 = arith.constant 0 : index
      %c0_138 = arith.constant 0 : index
      %536 = vector.load %arg11[%c0_136, %c0_137, %c0_138] : memref<2x8x32xf32, #tpu.memory_space<vmem>>, vector<2x8x32xf32>
      tpu.vector_store %arg11[%c0_136, %c0_137, %c0_138], %535 {strides = array<i32>} : memref<2x8x32xf32, #tpu.memory_space<vmem>>, vector<2x8x32xf32>,
    } else {
    }
    %c0 = arith.constant 0 : index
    %c0_1 = arith.constant 0 : index
    %3 = vector.load %arg4[%c0, %c0_1] : memref<32x128xf32, #tpu.memory_space<vmem>>, vector<32x128xf32>
    %c0_2 = arith.constant 0 : index
    %c0_3 = arith.constant 0 : index
    %4 = vector.load %arg5[%c0_2, %c0_3] : memref<64x128xf32, #tpu.memory_space<vmem>>, vector<64x128xf32>
    %c0_4 = arith.constant 0 : index
    %c0_5 = arith.constant 0 : index
    %5 = vector.load %arg6[%c0_4, %c0_5] : memref<1x128xf32, #tpu.memory_space<vmem>>, vector<1x128xf32>
    %c0_6 = arith.constant 0 : index
    %c0_7 = arith.constant 0 : index
    %c0_8 = arith.constant 0 : index
    %6 = vector.load %arg10[%c0_6, %c0_7, %c0_8] : memref<2x8x32xf32, #tpu.memory_space<vmem>>, vector<1x8x32xf32>
    %7 = vector.shape_cast %6 : vector<1x8x32xf32> to vector<8x32xf32>
    %c0_9 = arith.constant 0 : index
    %c0_10 = arith.constant 0 : index
    %c0_11 = arith.constant 0 : index
    %8 = vector.load %arg11[%c0_9, %c0_10, %c0_11] : memref<2x8x32xf32, #tpu.memory_space<vmem>>, vector<1x8x32xf32>
    %9 = vector.shape_cast %8 : vector<1x8x32xf32> to vector<8x32xf32>
    %c1 = arith.constant 1 : index
    %c0_12 = arith.constant 0 : index
    %c0_13 = arith.constant 0 : index
    %10 = vector.load %arg10[%c1, %c0_12, %c0_13] : memref<2x8x32xf32, #tpu.memory_space<vmem>>, vector<1x8x32xf32>
    %11 = vector.shape_cast %10 : vector<1x8x32xf32> to vector<8x32xf32>
    %c1_14 = arith.constant 1 : index
    %c0_15 = arith.constant 0 : index
    %c0_16 = arith.constant 0 : index
    %12 = vector.load %arg11[%c1_14, %c0_15, %c0_16] : memref<2x8x32xf32, #tpu.memory_space<vmem>>, vector<1x8x32xf32>
    %13 = vector.shape_cast %12 : vector<1x8x32xf32> to vector<8x32xf32>
    %c0_i32_17 = arith.constant 0 : i32
    %14 = arith.index_cast %c0_i32_17 : i32 to index
    %c0_18 = arith.constant 0 : index
    %c0_19 = arith.constant 0 : index
    %15 = vector.load %arg1[%14, %c0_18, %c0_19] : memref<8x8x128xf32, #tpu.memory_space<vmem>>, vector<1x8x128xf32>
    %16 = vector.shape_cast %15 : vector<1x8x128xf32> to vector<8x128xf32>
    %cst = arith.constant dense<0.000000e+00> : vector<8x128xf32>
    %17 = tpu.matmul %7, %3, %cst {dimension_numbers = #tpu.dot_dimension_numbers<[1], [0], [0], [1], [0, 0, 1, 1], [], []>} : vector<8x32xf32>, vector<32x128xf32>, vector<8x128xf32> -> vector<8x128xf32>
    %18 = arith.addf %16, %17 : vector<8x128xf32>
    %19 = vector.extract_strided_slice %18 {offsets = [0, 0], sizes = [8, 32], strides = [1, 1]} : vector<8x128xf32> to vector<8x32xf32>
    %20 = arith.negf %19 : vector<8x32xf32>
    %21 = math.exp %20 : vector<8x32xf32>
    %cst_20 = arith.constant 1.000000e+00 : f32
    %22 = vector.broadcast %cst_20 : f32 to vector<8x32xf32>
    %23 = arith.addf %22, %21 : vector<8x32xf32>
    %24 = arith.divf %22, %23 : vector<8x32xf32>
    %25 = vector.extract_strided_slice %18 {offsets = [0, 32], sizes = [8, 32], strides = [1, 1]} : vector<8x128xf32> to vector<8x32xf32>
    %26 = arith.negf %25 : vector<8x32xf32>
    %27 = math.exp %26 : vector<8x32xf32>
    %cst_21 = arith.constant 1.000000e+00 : f32
    %28 = vector.broadcast %cst_21 : f32 to vector<8x32xf32>
    %29 = arith.addf %28, %27 : vector<8x32xf32>
    %30 = arith.divf %28, %29 : vector<8x32xf32>
    %31 = vector.extract_strided_slice %18 {offsets = [0, 64], sizes = [8, 32], strides = [1, 1]} : vector<8x128xf32> to vector<8x32xf32>
    %32 = math.tanh %31 : vector<8x32xf32>
    %33 = vector.extract_strided_slice %18 {offsets = [0, 96], sizes = [8, 32], strides = [1, 1]} : vector<8x128xf32> to vector<8x32xf32>
    %34 = arith.negf %33 : vector<8x32xf32>
    %35 = math.exp %34 : vector<8x32xf32>
    %cst_22 = arith.constant 1.000000e+00 : f32
    %36 = vector.broadcast %cst_22 : f32 to vector<8x32xf32>
    %37 = arith.addf %36, %35 : vector<8x32xf32>
    %38 = arith.divf %36, %37 : vector<8x32xf32>
    %39 = arith.mulf %30, %9 : vector<8x32xf32>
    %40 = arith.mulf %24, %32 : vector<8x32xf32>
    %41 = arith.addf %39, %40 : vector<8x32xf32>
    %42 = math.tanh %41 : vector<8x32xf32>
    %43 = arith.mulf %38, %42 : vector<8x32xf32>
    %44 = tpu.concatenate %43, %11 in 1 : vector<8x32xf32>, vector<8x32xf32> -> vector<8x64xf32>
    %cst_23 = arith.constant dense<0.000000e+00> : vector<8x128xf32>
    %45 = tpu.matmul %44, %4, %cst_23 {dimension_numbers = #tpu.dot_dimension_numbers<[1], [0], [0], [1], [0, 0, 1, 1], [], []>} : vector<8x64xf32>, vector<64x128xf32>, vector<8x128xf32> -> vector<8x128xf32>
    %46 = vector.broadcast %5 : vector<1x128xf32> to vector<8x128xf32>
    %47 = arith.addf %45, %46 : vector<8x128xf32>
    %48 = vector.extract_strided_slice %47 {offsets = [0, 0], sizes = [8, 32], strides = [1, 1]} : vector<8x128xf32> to vector<8x32xf32>
    %49 = arith.negf %48 : vector<8x32xf32>
    %50 = math.exp %49 : vector<8x32xf32>
    %cst_24 = arith.constant 1.000000e+00 : f32
    %51 = vector.broadcast %cst_24 : f32 to vector<8x32xf32>
    %52 = arith.addf %51, %50 : vector<8x32xf32>
    %53 = arith.divf %51, %52 : vector<8x32xf32>
    %54 = vector.extract_strided_slice %47 {offsets = [0, 32], sizes = [8, 32], strides = [1, 1]} : vector<8x128xf32> to vector<8x32xf32>
    %55 = arith.negf %54 : vector<8x32xf32>
    %56 = math.exp %55 : vector<8x32xf32>
    %cst_25 = arith.constant 1.000000e+00 : f32
    %57 = vector.broadcast %cst_25 : f32 to vector<8x32xf32>
    %58 = arith.addf %57, %56 : vector<8x32xf32>
    %59 = arith.divf %57, %58 : vector<8x32xf32>
    %60 = vector.extract_strided_slice %47 {offsets = [0, 64], sizes = [8, 32], strides = [1, 1]} : vector<8x128xf32> to vector<8x32xf32>
    %61 = math.tanh %60 : vector<8x32xf32>
    %62 = vector.extract_strided_slice %47 {offsets = [0, 96], sizes = [8, 32], strides = [1, 1]} : vector<8x128xf32> to vector<8x32xf32>
    %63 = arith.negf %62 : vector<8x32xf32>
    %64 = math.exp %63 : vector<8x32xf32>
    %cst_26 = arith.constant 1.000000e+00 : f32
    %65 = vector.broadcast %cst_26 : f32 to vector<8x32xf32>
    %66 = arith.addf %65, %64 : vector<8x32xf32>
    %67 = arith.divf %65, %66 : vector<8x32xf32>
    %68 = arith.mulf %59, %13 : vector<8x32xf32>
    %69 = arith.mulf %53, %61 : vector<8x32xf32>
    %70 = arith.addf %68, %69 : vector<8x32xf32>
    %71 = math.tanh %70 : vector<8x32xf32>
    %72 = arith.mulf %67, %71 : vector<8x32xf32>
    %73 = arith.index_cast %c0_i32_17 : i32 to index
    %c0_27 = arith.constant 0 : index
    %c0_28 = arith.constant 0 : index
    %74 = vector.load %arg7[%73, %c0_27, %c0_28] : memref<8x8x32xf32, #tpu.memory_space<vmem>>, vector<1x8x32xf32>
    %75 = vector.shape_cast %74 : vector<1x8x32xf32> to vector<8x32xf32>
    %76 = vector.shape_cast %72 : vector<8x32xf32> to vector<1x8x32xf32>
    tpu.vector_store %arg7[%73, %c0_27, %c0_28], %76 {strides = array<i32>} : memref<8x8x32xf32, #tpu.memory_space<vmem>>, vector<1x8x32xf32>,
    %c1_i32 = arith.constant 1 : i32
    %77 = arith.index_cast %c1_i32 : i32 to index
    %c0_29 = arith.constant 0 : index
    %c0_30 = arith.constant 0 : index
    %78 = vector.load %arg1[%77, %c0_29, %c0_30] : memref<8x8x128xf32, #tpu.memory_space<vmem>>, vector<1x8x128xf32>
    %79 = vector.shape_cast %78 : vector<1x8x128xf32> to vector<8x128xf32>
    %cst_31 = arith.constant dense<0.000000e+00> : vector<8x128xf32>
    %80 = tpu.matmul %43, %3, %cst_31 {dimension_numbers = #tpu.dot_dimension_numbers<[1], [0], [0], [1], [0, 0, 1, 1], [], []>} : vector<8x32xf32>, vector<32x128xf32>, vector<8x128xf32> -> vector<8x128xf32>
    %81 = arith.addf %79, %80 : vector<8x128xf32>
    %82 = vector.extract_strided_slice %81 {offsets = [0, 0], sizes = [8, 32], strides = [1, 1]} : vector<8x128xf32> to vector<8x32xf32>
    %83 = arith.negf %82 : vector<8x32xf32>
    %84 = math.exp %83 : vector<8x32xf32>
    %cst_32 = arith.constant 1.000000e+00 : f32
    %85 = vector.broadcast %cst_32 : f32 to vector<8x32xf32>
    %86 = arith.addf %85, %84 : vector<8x32xf32>
    %87 = arith.divf %85, %86 : vector<8x32xf32>
    %88 = vector.extract_strided_slice %81 {offsets = [0, 32], sizes = [8, 32], strides = [1, 1]} : vector<8x128xf32> to vector<8x32xf32>
    %89 = arith.negf %88 : vector<8x32xf32>
    %90 = math.exp %89 : vector<8x32xf32>
    %cst_33 = arith.constant 1.000000e+00 : f32
    %91 = vector.broadcast %cst_33 : f32 to vector<8x32xf32>
    %92 = arith.addf %91, %90 : vector<8x32xf32>
    %93 = arith.divf %91, %92 : vector<8x32xf32>
    %94 = vector.extract_strided_slice %81 {offsets = [0, 64], sizes = [8, 32], strides = [1, 1]} : vector<8x128xf32> to vector<8x32xf32>
    %95 = math.tanh %94 : vector<8x32xf32>
    %96 = vector.extract_strided_slice %81 {offsets = [0, 96], sizes = [8, 32], strides = [1, 1]} : vector<8x128xf32> to vector<8x32xf32>
    %97 = arith.negf %96 : vector<8x32xf32>
    %98 = math.exp %97 : vector<8x32xf32>
    %cst_34 = arith.constant 1.000000e+00 : f32
    %99 = vector.broadcast %cst_34 : f32 to vector<8x32xf32>
    %100 = arith.addf %99, %98 : vector<8x32xf32>
    %101 = arith.divf %99, %100 : vector<8x32xf32>
    %102 = arith.mulf %93, %41 : vector<8x32xf32>
    %103 = arith.mulf %87, %95 : vector<8x32xf32>
    %104 = arith.addf %102, %103 : vector<8x32xf32>
    %105 = math.tanh %104 : vector<8x32xf32>
    %106 = arith.mulf %101, %105 : vector<8x32xf32>
    %107 = tpu.concatenate %106, %72 in 1 : vector<8x32xf32>, vector<8x32xf32> -> vector<8x64xf32>
    %cst_35 = arith.constant dense<0.000000e+00> : vector<8x128xf32>
    %108 = tpu.matmul %107, %4, %cst_35 {dimension_numbers = #tpu.dot_dimension_numbers<[1], [0], [0], [1], [0, 0, 1, 1], [], []>} : vector<8x64xf32>, vector<64x128xf32>, vector<8x128xf32> -> vector<8x128xf32>
    %109 = vector.broadcast %5 : vector<1x128xf32> to vector<8x128xf32>
    %110 = arith.addf %108, %109 : vector<8x128xf32>
    %111 = vector.extract_strided_slice %110 {offsets = [0, 0], sizes = [8, 32], strides = [1, 1]} : vector<8x128xf32> to vector<8x32xf32>
    %112 = arith.negf %111 : vector<8x32xf32>
    %113 = math.exp %112 : vector<8x32xf32>
    %cst_36 = arith.constant 1.000000e+00 : f32
    %114 = vector.broadcast %cst_36 : f32 to vector<8x32xf32>
    %115 = arith.addf %114, %113 : vector<8x32xf32>
    %116 = arith.divf %114, %115 : vector<8x32xf32>
    %117 = vector.extract_strided_slice %110 {offsets = [0, 32], sizes = [8, 32], strides = [1, 1]} : vector<8x128xf32> to vector<8x32xf32>
    %118 = arith.negf %117 : vector<8x32xf32>
    %119 = math.exp %118 : vector<8x32xf32>
    %cst_37 = arith.constant 1.000000e+00 : f32
    %120 = vector.broadcast %cst_37 : f32 to vector<8x32xf32>
    %121 = arith.addf %120, %119 : vector<8x32xf32>
    %122 = arith.divf %120, %121 : vector<8x32xf32>
    %123 = vector.extract_strided_slice %110 {offsets = [0, 64], sizes = [8, 32], strides = [1, 1]} : vector<8x128xf32> to vector<8x32xf32>
    %124 = math.tanh %123 : vector<8x32xf32>
    %125 = vector.extract_strided_slice %110 {offsets = [0, 96], sizes = [8, 32], strides = [1, 1]} : vector<8x128xf32> to vector<8x32xf32>
    %126 = arith.negf %125 : vector<8x32xf32>
    %127 = math.exp %126 : vector<8x32xf32>
    %cst_38 = arith.constant 1.000000e+00 : f32
    %128 = vector.broadcast %cst_38 : f32 to vector<8x32xf32>
    %129 = arith.addf %128, %127 : vector<8x32xf32>
    %130 = arith.divf %128, %129 : vector<8x32xf32>
    %131 = arith.mulf %122, %70 : vector<8x32xf32>
    %132 = arith.mulf %116, %124 : vector<8x32xf32>
    %133 = arith.addf %131, %132 : vector<8x32xf32>
    %134 = math.tanh %133 : vector<8x32xf32>
    %135 = arith.mulf %130, %134 : vector<8x32xf32>
    %136 = arith.index_cast %c1_i32 : i32 to index
    %c0_39 = arith.constant 0 : index
    %c0_40 = arith.constant 0 : index
    %137 = vector.load %arg7[%136, %c0_39, %c0_40] : memref<8x8x32xf32, #tpu.memory_space<vmem>>, vector<1x8x32xf32>
    %138 = vector.shape_cast %137 : vector<1x8x32xf32> to vector<8x32xf32>
    %139 = vector.shape_cast %135 : vector<8x32xf32> to vector<1x8x32xf32>
    tpu.vector_store %arg7[%136, %c0_39, %c0_40], %139 {strides = array<i32>} : memref<8x8x32xf32, #tpu.memory_space<vmem>>, vector<1x8x32xf32>,
    %c2_i32 = arith.constant 2 : i32
    %140 = arith.index_cast %c2_i32 : i32 to index
    %c0_41 = arith.constant 0 : index
    %c0_42 = arith.constant 0 : index
    %141 = vector.load %arg1[%140, %c0_41, %c0_42] : memref<8x8x128xf32, #tpu.memory_space<vmem>>, vector<1x8x128xf32>
    %142 = vector.shape_cast %141 : vector<1x8x128xf32> to vector<8x128xf32>
    %cst_43 = arith.constant dense<0.000000e+00> : vector<8x128xf32>
    %143 = tpu.matmul %106, %3, %cst_43 {dimension_numbers = #tpu.dot_dimension_numbers<[1], [0], [0], [1], [0, 0, 1, 1], [], []>} : vector<8x32xf32>, vector<32x128xf32>, vector<8x128xf32> -> vector<8x128xf32>
    %144 = arith.addf %142, %143 : vector<8x128xf32>
    %145 = vector.extract_strided_slice %144 {offsets = [0, 0], sizes = [8, 32], strides = [1, 1]} : vector<8x128xf32> to vector<8x32xf32>
    %146 = arith.negf %145 : vector<8x32xf32>
    %147 = math.exp %146 : vector<8x32xf32>
    %cst_44 = arith.constant 1.000000e+00 : f32
    %148 = vector.broadcast %cst_44 : f32 to vector<8x32xf32>
    %149 = arith.addf %148, %147 : vector<8x32xf32>
    %150 = arith.divf %148, %149 : vector<8x32xf32>
    %151 = vector.extract_strided_slice %144 {offsets = [0, 32], sizes = [8, 32], strides = [1, 1]} : vector<8x128xf32> to vector<8x32xf32>
    %152 = arith.negf %151 : vector<8x32xf32>
    %153 = math.exp %152 : vector<8x32xf32>
    %cst_45 = arith.constant 1.000000e+00 : f32
    %154 = vector.broadcast %cst_45 : f32 to vector<8x32xf32>
    %155 = arith.addf %154, %153 : vector<8x32xf32>
    %156 = arith.divf %154, %155 : vector<8x32xf32>
    %157 = vector.extract_strided_slice %144 {offsets = [0, 64], sizes = [8, 32], strides = [1, 1]} : vector<8x128xf32> to vector<8x32xf32>
    %158 = math.tanh %157 : vector<8x32xf32>
    %159 = vector.extract_strided_slice %144 {offsets = [0, 96], sizes = [8, 32], strides = [1, 1]} : vector<8x128xf32> to vector<8x32xf32>
    %160 = arith.negf %159 : vector<8x32xf32>
    %161 = math.exp %160 : vector<8x32xf32>
    %cst_46 = arith.constant 1.000000e+00 : f32
    %162 = vector.broadcast %cst_46 : f32 to vector<8x32xf32>
    %163 = arith.addf %162, %161 : vector<8x32xf32>
    %164 = arith.divf %162, %163 : vector<8x32xf32>
    %165 = arith.mulf %156, %104 : vector<8x32xf32>
    %166 = arith.mulf %150, %158 : vector<8x32xf32>
    %167 = arith.addf %165, %166 : vector<8x32xf32>
    %168 = math.tanh %167 : vector<8x32xf32>
    %169 = arith.mulf %164, %168 : vector<8x32xf32>
    %170 = tpu.concatenate %169, %135 in 1 : vector<8x32xf32>, vector<8x32xf32> -> vector<8x64xf32>
    %cst_47 = arith.constant dense<0.000000e+00> : vector<8x128xf32>
    %171 = tpu.matmul %170, %4, %cst_47 {dimension_numbers = #tpu.dot_dimension_numbers<[1], [0], [0], [1], [0, 0, 1, 1], [], []>} : vector<8x64xf32>, vector<64x128xf32>, vector<8x128xf32> -> vector<8x128xf32>
    %172 = vector.broadcast %5 : vector<1x128xf32> to vector<8x128xf32>
    %173 = arith.addf %171, %172 : vector<8x128xf32>
    %174 = vector.extract_strided_slice %173 {offsets = [0, 0], sizes = [8, 32], strides = [1, 1]} : vector<8x128xf32> to vector<8x32xf32>
    %175 = arith.negf %174 : vector<8x32xf32>
    %176 = math.exp %175 : vector<8x32xf32>
    %cst_48 = arith.constant 1.000000e+00 : f32
    %177 = vector.broadcast %cst_48 : f32 to vector<8x32xf32>
    %178 = arith.addf %177, %176 : vector<8x32xf32>
    %179 = arith.divf %177, %178 : vector<8x32xf32>
    %180 = vector.extract_strided_slice %173 {offsets = [0, 32], sizes = [8, 32], strides = [1, 1]} : vector<8x128xf32> to vector<8x32xf32>
    %181 = arith.negf %180 : vector<8x32xf32>
    %182 = math.exp %181 : vector<8x32xf32>
    %cst_49 = arith.constant 1.000000e+00 : f32
    %183 = vector.broadcast %cst_49 : f32 to vector<8x32xf32>
    %184 = arith.addf %183, %182 : vector<8x32xf32>
    %185 = arith.divf %183, %184 : vector<8x32xf32>
    %186 = vector.extract_strided_slice %173 {offsets = [0, 64], sizes = [8, 32], strides = [1, 1]} : vector<8x128xf32> to vector<8x32xf32>
    %187 = math.tanh %186 : vector<8x32xf32>
    %188 = vector.extract_strided_slice %173 {offsets = [0, 96], sizes = [8, 32], strides = [1, 1]} : vector<8x128xf32> to vector<8x32xf32>
    %189 = arith.negf %188 : vector<8x32xf32>
    %190 = math.exp %189 : vector<8x32xf32>
    %cst_50 = arith.constant 1.000000e+00 : f32
    %191 = vector.broadcast %cst_50 : f32 to vector<8x32xf32>
    %192 = arith.addf %191, %190 : vector<8x32xf32>
    %193 = arith.divf %191, %192 : vector<8x32xf32>
    %194 = arith.mulf %185, %133 : vector<8x32xf32>
    %195 = arith.mulf %179, %187 : vector<8x32xf32>
    %196 = arith.addf %194, %195 : vector<8x32xf32>
    %197 = math.tanh %196 : vector<8x32xf32>
    %198 = arith.mulf %193, %197 : vector<8x32xf32>
    %199 = arith.index_cast %c2_i32 : i32 to index
    %c0_51 = arith.constant 0 : index
    %c0_52 = arith.constant 0 : index
    %200 = vector.load %arg7[%199, %c0_51, %c0_52] : memref<8x8x32xf32, #tpu.memory_space<vmem>>, vector<1x8x32xf32>
    %201 = vector.shape_cast %200 : vector<1x8x32xf32> to vector<8x32xf32>
    %202 = vector.shape_cast %198 : vector<8x32xf32> to vector<1x8x32xf32>
    tpu.vector_store %arg7[%199, %c0_51, %c0_52], %202 {strides = array<i32>} : memref<8x8x32xf32, #tpu.memory_space<vmem>>, vector<1x8x32xf32>,
    %c3_i32 = arith.constant 3 : i32
    %203 = arith.index_cast %c3_i32 : i32 to index
    %c0_53 = arith.constant 0 : index
    %c0_54 = arith.constant 0 : index
    %204 = vector.load %arg1[%203, %c0_53, %c0_54] : memref<8x8x128xf32, #tpu.memory_space<vmem>>, vector<1x8x128xf32>
    %205 = vector.shape_cast %204 : vector<1x8x128xf32> to vector<8x128xf32>
    %cst_55 = arith.constant dense<0.000000e+00> : vector<8x128xf32>
    %206 = tpu.matmul %169, %3, %cst_55 {dimension_numbers = #tpu.dot_dimension_numbers<[1], [0], [0], [1], [0, 0, 1, 1], [], []>} : vector<8x32xf32>, vector<32x128xf32>, vector<8x128xf32> -> vector<8x128xf32>
    %207 = arith.addf %205, %206 : vector<8x128xf32>
    %208 = vector.extract_strided_slice %207 {offsets = [0, 0], sizes = [8, 32], strides = [1, 1]} : vector<8x128xf32> to vector<8x32xf32>
    %209 = arith.negf %208 : vector<8x32xf32>
    %210 = math.exp %209 : vector<8x32xf32>
    %cst_56 = arith.constant 1.000000e+00 : f32
    %211 = vector.broadcast %cst_56 : f32 to vector<8x32xf32>
    %212 = arith.addf %211, %210 : vector<8x32xf32>
    %213 = arith.divf %211, %212 : vector<8x32xf32>
    %214 = vector.extract_strided_slice %207 {offsets = [0, 32], sizes = [8, 32], strides = [1, 1]} : vector<8x128xf32> to vector<8x32xf32>
    %215 = arith.negf %214 : vector<8x32xf32>
    %216 = math.exp %215 : vector<8x32xf32>
    %cst_57 = arith.constant 1.000000e+00 : f32
    %217 = vector.broadcast %cst_57 : f32 to vector<8x32xf32>
    %218 = arith.addf %217, %216 : vector<8x32xf32>
    %219 = arith.divf %217, %218 : vector<8x32xf32>
    %220 = vector.extract_strided_slice %207 {offsets = [0, 64], sizes = [8, 32], strides = [1, 1]} : vector<8x128xf32> to vector<8x32xf32>
    %221 = math.tanh %220 : vector<8x32xf32>
    %222 = vector.extract_strided_slice %207 {offsets = [0, 96], sizes = [8, 32], strides = [1, 1]} : vector<8x128xf32> to vector<8x32xf32>
    %223 = arith.negf %222 : vector<8x32xf32>
    %224 = math.exp %223 : vector<8x32xf32>
    %cst_58 = arith.constant 1.000000e+00 : f32
    %225 = vector.broadcast %cst_58 : f32 to vector<8x32xf32>
    %226 = arith.addf %225, %224 : vector<8x32xf32>
    %227 = arith.divf %225, %226 : vector<8x32xf32>
    %228 = arith.mulf %219, %167 : vector<8x32xf32>
    %229 = arith.mulf %213, %221 : vector<8x32xf32>
    %230 = arith.addf %228, %229 : vector<8x32xf32>
    %231 = math.tanh %230 : vector<8x32xf32>
    %232 = arith.mulf %227, %231 : vector<8x32xf32>
    %233 = tpu.concatenate %232, %198 in 1 : vector<8x32xf32>, vector<8x32xf32> -> vector<8x64xf32>
    %cst_59 = arith.constant dense<0.000000e+00> : vector<8x128xf32>
    %234 = tpu.matmul %233, %4, %cst_59 {dimension_numbers = #tpu.dot_dimension_numbers<[1], [0], [0], [1], [0, 0, 1, 1], [], []>} : vector<8x64xf32>, vector<64x128xf32>, vector<8x128xf32> -> vector<8x128xf32>
    %235 = vector.broadcast %5 : vector<1x128xf32> to vector<8x128xf32>
    %236 = arith.addf %234, %235 : vector<8x128xf32>
    %237 = vector.extract_strided_slice %236 {offsets = [0, 0], sizes = [8, 32], strides = [1, 1]} : vector<8x128xf32> to vector<8x32xf32>
    %238 = arith.negf %237 : vector<8x32xf32>
    %239 = math.exp %238 : vector<8x32xf32>
    %cst_60 = arith.constant 1.000000e+00 : f32
    %240 = vector.broadcast %cst_60 : f32 to vector<8x32xf32>
    %241 = arith.addf %240, %239 : vector<8x32xf32>
    %242 = arith.divf %240, %241 : vector<8x32xf32>
    %243 = vector.extract_strided_slice %236 {offsets = [0, 32], sizes = [8, 32], strides = [1, 1]} : vector<8x128xf32> to vector<8x32xf32>
    %244 = arith.negf %243 : vector<8x32xf32>
    %245 = math.exp %244 : vector<8x32xf32>
    %cst_61 = arith.constant 1.000000e+00 : f32
    %246 = vector.broadcast %cst_61 : f32 to vector<8x32xf32>
    %247 = arith.addf %246, %245 : vector<8x32xf32>
    %248 = arith.divf %246, %247 : vector<8x32xf32>
    %249 = vector.extract_strided_slice %236 {offsets = [0, 64], sizes = [8, 32], strides = [1, 1]} : vector<8x128xf32> to vector<8x32xf32>
    %250 = math.tanh %249 : vector<8x32xf32>
    %251 = vector.extract_strided_slice %236 {offsets = [0, 96], sizes = [8, 32], strides = [1, 1]} : vector<8x128xf32> to vector<8x32xf32>
    %252 = arith.negf %251 : vector<8x32xf32>
    %253 = math.exp %252 : vector<8x32xf32>
    %cst_62 = arith.constant 1.000000e+00 : f32
    %254 = vector.broadcast %cst_62 : f32 to vector<8x32xf32>
    %255 = arith.addf %254, %253 : vector<8x32xf32>
    %256 = arith.divf %254, %255 : vector<8x32xf32>
    %257 = arith.mulf %248, %196 : vector<8x32xf32>
    %258 = arith.mulf %242, %250 : vector<8x32xf32>
    %259 = arith.addf %257, %258 : vector<8x32xf32>
    %260 = math.tanh %259 : vector<8x32xf32>
    %261 = arith.mulf %256, %260 : vector<8x32xf32>
    %262 = arith.index_cast %c3_i32 : i32 to index
    %c0_63 = arith.constant 0 : index
    %c0_64 = arith.constant 0 : index
    %263 = vector.load %arg7[%262, %c0_63, %c0_64] : memref<8x8x32xf32, #tpu.memory_space<vmem>>, vector<1x8x32xf32>
    %264 = vector.shape_cast %263 : vector<1x8x32xf32> to vector<8x32xf32>
    %265 = vector.shape_cast %261 : vector<8x32xf32> to vector<1x8x32xf32>
    tpu.vector_store %arg7[%262, %c0_63, %c0_64], %265 {strides = array<i32>} : memref<8x8x32xf32, #tpu.memory_space<vmem>>, vector<1x8x32xf32>,
    %c4_i32 = arith.constant 4 : i32
    %266 = arith.index_cast %c4_i32 : i32 to index
    %c0_65 = arith.constant 0 : index
    %c0_66 = arith.constant 0 : index
    %267 = vector.load %arg1[%266, %c0_65, %c0_66] : memref<8x8x128xf32, #tpu.memory_space<vmem>>, vector<1x8x128xf32>
    %268 = vector.shape_cast %267 : vector<1x8x128xf32> to vector<8x128xf32>
    %cst_67 = arith.constant dense<0.000000e+00> : vector<8x128xf32>
    %269 = tpu.matmul %232, %3, %cst_67 {dimension_numbers = #tpu.dot_dimension_numbers<[1], [0], [0], [1], [0, 0, 1, 1], [], []>} : vector<8x32xf32>, vector<32x128xf32>, vector<8x128xf32> -> vector<8x128xf32>
    %270 = arith.addf %268, %269 : vector<8x128xf32>
    %271 = vector.extract_strided_slice %270 {offsets = [0, 0], sizes = [8, 32], strides = [1, 1]} : vector<8x128xf32> to vector<8x32xf32>
    %272 = arith.negf %271 : vector<8x32xf32>
    %273 = math.exp %272 : vector<8x32xf32>
    %cst_68 = arith.constant 1.000000e+00 : f32
    %274 = vector.broadcast %cst_68 : f32 to vector<8x32xf32>
    %275 = arith.addf %274, %273 : vector<8x32xf32>
    %276 = arith.divf %274, %275 : vector<8x32xf32>
    %277 = vector.extract_strided_slice %270 {offsets = [0, 32], sizes = [8, 32], strides = [1, 1]} : vector<8x128xf32> to vector<8x32xf32>
    %278 = arith.negf %277 : vector<8x32xf32>
    %279 = math.exp %278 : vector<8x32xf32>
    %cst_69 = arith.constant 1.000000e+00 : f32
    %280 = vector.broadcast %cst_69 : f32 to vector<8x32xf32>
    %281 = arith.addf %280, %279 : vector<8x32xf32>
    %282 = arith.divf %280, %281 : vector<8x32xf32>
    %283 = vector.extract_strided_slice %270 {offsets = [0, 64], sizes = [8, 32], strides = [1, 1]} : vector<8x128xf32> to vector<8x32xf32>
    %284 = math.tanh %283 : vector<8x32xf32>
    %285 = vector.extract_strided_slice %270 {offsets = [0, 96], sizes = [8, 32], strides = [1, 1]} : vector<8x128xf32> to vector<8x32xf32>
    %286 = arith.negf %285 : vector<8x32xf32>
    %287 = math.exp %286 : vector<8x32xf32>
    %cst_70 = arith.constant 1.000000e+00 : f32
    %288 = vector.broadcast %cst_70 : f32 to vector<8x32xf32>
    %289 = arith.addf %288, %287 : vector<8x32xf32>
    %290 = arith.divf %288, %289 : vector<8x32xf32>
    %291 = arith.mulf %282, %230 : vector<8x32xf32>
    %292 = arith.mulf %276, %284 : vector<8x32xf32>
    %293 = arith.addf %291, %292 : vector<8x32xf32>
    %294 = math.tanh %293 : vector<8x32xf32>
    %295 = arith.mulf %290, %294 : vector<8x32xf32>
    %296 = tpu.concatenate %295, %261 in 1 : vector<8x32xf32>, vector<8x32xf32> -> vector<8x64xf32>
    %cst_71 = arith.constant dense<0.000000e+00> : vector<8x128xf32>
    %297 = tpu.matmul %296, %4, %cst_71 {dimension_numbers = #tpu.dot_dimension_numbers<[1], [0], [0], [1], [0, 0, 1, 1], [], []>} : vector<8x64xf32>, vector<64x128xf32>, vector<8x128xf32> -> vector<8x128xf32>
    %298 = vector.broadcast %5 : vector<1x128xf32> to vector<8x128xf32>
    %299 = arith.addf %297, %298 : vector<8x128xf32>
    %300 = vector.extract_strided_slice %299 {offsets = [0, 0], sizes = [8, 32], strides = [1, 1]} : vector<8x128xf32> to vector<8x32xf32>
    %301 = arith.negf %300 : vector<8x32xf32>
    %302 = math.exp %301 : vector<8x32xf32>
    %cst_72 = arith.constant 1.000000e+00 : f32
    %303 = vector.broadcast %cst_72 : f32 to vector<8x32xf32>
    %304 = arith.addf %303, %302 : vector<8x32xf32>
    %305 = arith.divf %303, %304 : vector<8x32xf32>
    %306 = vector.extract_strided_slice %299 {offsets = [0, 32], sizes = [8, 32], strides = [1, 1]} : vector<8x128xf32> to vector<8x32xf32>
    %307 = arith.negf %306 : vector<8x32xf32>
    %308 = math.exp %307 : vector<8x32xf32>
    %cst_73 = arith.constant 1.000000e+00 : f32
    %309 = vector.broadcast %cst_73 : f32 to vector<8x32xf32>
    %310 = arith.addf %309, %308 : vector<8x32xf32>
    %311 = arith.divf %309, %310 : vector<8x32xf32>
    %312 = vector.extract_strided_slice %299 {offsets = [0, 64], sizes = [8, 32], strides = [1, 1]} : vector<8x128xf32> to vector<8x32xf32>
    %313 = math.tanh %312 : vector<8x32xf32>
    %314 = vector.extract_strided_slice %299 {offsets = [0, 96], sizes = [8, 32], strides = [1, 1]} : vector<8x128xf32> to vector<8x32xf32>
    %315 = arith.negf %314 : vector<8x32xf32>
    %316 = math.exp %315 : vector<8x32xf32>
    %cst_74 = arith.constant 1.000000e+00 : f32
    %317 = vector.broadcast %cst_74 : f32 to vector<8x32xf32>
    %318 = arith.addf %317, %316 : vector<8x32xf32>
    %319 = arith.divf %317, %318 : vector<8x32xf32>
    %320 = arith.mulf %311, %259 : vector<8x32xf32>
    %321 = arith.mulf %305, %313 : vector<8x32xf32>
    %322 = arith.addf %320, %321 : vector<8x32xf32>
    %323 = math.tanh %322 : vector<8x32xf32>
    %324 = arith.mulf %319, %323 : vector<8x32xf32>
    %325 = arith.index_cast %c4_i32 : i32 to index
    %c0_75 = arith.constant 0 : index
    %c0_76 = arith.constant 0 : index
    %326 = vector.load %arg7[%325, %c0_75, %c0_76] : memref<8x8x32xf32, #tpu.memory_space<vmem>>, vector<1x8x32xf32>
    %327 = vector.shape_cast %326 : vector<1x8x32xf32> to vector<8x32xf32>
    %328 = vector.shape_cast %324 : vector<8x32xf32> to vector<1x8x32xf32>
    tpu.vector_store %arg7[%325, %c0_75, %c0_76], %328 {strides = array<i32>} : memref<8x8x32xf32, #tpu.memory_space<vmem>>, vector<1x8x32xf32>,
    %c5_i32 = arith.constant 5 : i32
    %329 = arith.index_cast %c5_i32 : i32 to index
    %c0_77 = arith.constant 0 : index
    %c0_78 = arith.constant 0 : index
    %330 = vector.load %arg1[%329, %c0_77, %c0_78] : memref<8x8x128xf32, #tpu.memory_space<vmem>>, vector<1x8x128xf32>
    %331 = vector.shape_cast %330 : vector<1x8x128xf32> to vector<8x128xf32>
    %cst_79 = arith.constant dense<0.000000e+00> : vector<8x128xf32>
    %332 = tpu.matmul %295, %3, %cst_79 {dimension_numbers = #tpu.dot_dimension_numbers<[1], [0], [0], [1], [0, 0, 1, 1], [], []>} : vector<8x32xf32>, vector<32x128xf32>, vector<8x128xf32> -> vector<8x128xf32>
    %333 = arith.addf %331, %332 : vector<8x128xf32>
    %334 = vector.extract_strided_slice %333 {offsets = [0, 0], sizes = [8, 32], strides = [1, 1]} : vector<8x128xf32> to vector<8x32xf32>
    %335 = arith.negf %334 : vector<8x32xf32>
    %336 = math.exp %335 : vector<8x32xf32>
    %cst_80 = arith.constant 1.000000e+00 : f32
    %337 = vector.broadcast %cst_80 : f32 to vector<8x32xf32>
    %338 = arith.addf %337, %336 : vector<8x32xf32>
    %339 = arith.divf %337, %338 : vector<8x32xf32>
    %340 = vector.extract_strided_slice %333 {offsets = [0, 32], sizes = [8, 32], strides = [1, 1]} : vector<8x128xf32> to vector<8x32xf32>
    %341 = arith.negf %340 : vector<8x32xf32>
    %342 = math.exp %341 : vector<8x32xf32>
    %cst_81 = arith.constant 1.000000e+00 : f32
    %343 = vector.broadcast %cst_81 : f32 to vector<8x32xf32>
    %344 = arith.addf %343, %342 : vector<8x32xf32>
    %345 = arith.divf %343, %344 : vector<8x32xf32>
    %346 = vector.extract_strided_slice %333 {offsets = [0, 64], sizes = [8, 32], strides = [1, 1]} : vector<8x128xf32> to vector<8x32xf32>
    %347 = math.tanh %346 : vector<8x32xf32>
    %348 = vector.extract_strided_slice %333 {offsets = [0, 96], sizes = [8, 32], strides = [1, 1]} : vector<8x128xf32> to vector<8x32xf32>
    %349 = arith.negf %348 : vector<8x32xf32>
    %350 = math.exp %349 : vector<8x32xf32>
    %cst_82 = arith.constant 1.000000e+00 : f32
    %351 = vector.broadcast %cst_82 : f32 to vector<8x32xf32>
    %352 = arith.addf %351, %350 : vector<8x32xf32>
    %353 = arith.divf %351, %352 : vector<8x32xf32>
    %354 = arith.mulf %345, %293 : vector<8x32xf32>
    %355 = arith.mulf %339, %347 : vector<8x32xf32>
    %356 = arith.addf %354, %355 : vector<8x32xf32>
    %357 = math.tanh %356 : vector<8x32xf32>
    %358 = arith.mulf %353, %357 : vector<8x32xf32>
    %359 = tpu.concatenate %358, %324 in 1 : vector<8x32xf32>, vector<8x32xf32> -> vector<8x64xf32>
    %cst_83 = arith.constant dense<0.000000e+00> : vector<8x128xf32>
    %360 = tpu.matmul %359, %4, %cst_83 {dimension_numbers = #tpu.dot_dimension_numbers<[1], [0], [0], [1], [0, 0, 1, 1], [], []>} : vector<8x64xf32>, vector<64x128xf32>, vector<8x128xf32> -> vector<8x128xf32>
    %361 = vector.broadcast %5 : vector<1x128xf32> to vector<8x128xf32>
    %362 = arith.addf %360, %361 : vector<8x128xf32>
    %363 = vector.extract_strided_slice %362 {offsets = [0, 0], sizes = [8, 32], strides = [1, 1]} : vector<8x128xf32> to vector<8x32xf32>
    %364 = arith.negf %363 : vector<8x32xf32>
    %365 = math.exp %364 : vector<8x32xf32>
    %cst_84 = arith.constant 1.000000e+00 : f32
    %366 = vector.broadcast %cst_84 : f32 to vector<8x32xf32>
    %367 = arith.addf %366, %365 : vector<8x32xf32>
    %368 = arith.divf %366, %367 : vector<8x32xf32>
    %369 = vector.extract_strided_slice %362 {offsets = [0, 32], sizes = [8, 32], strides = [1, 1]} : vector<8x128xf32> to vector<8x32xf32>
    %370 = arith.negf %369 : vector<8x32xf32>
    %371 = math.exp %370 : vector<8x32xf32>
    %cst_85 = arith.constant 1.000000e+00 : f32
    %372 = vector.broadcast %cst_85 : f32 to vector<8x32xf32>
    %373 = arith.addf %372, %371 : vector<8x32xf32>
    %374 = arith.divf %372, %373 : vector<8x32xf32>
    %375 = vector.extract_strided_slice %362 {offsets = [0, 64], sizes = [8, 32], strides = [1, 1]} : vector<8x128xf32> to vector<8x32xf32>
    %376 = math.tanh %375 : vector<8x32xf32>
    %377 = vector.extract_strided_slice %362 {offsets = [0, 96], sizes = [8, 32], strides = [1, 1]} : vector<8x128xf32> to vector<8x32xf32>
    %378 = arith.negf %377 : vector<8x32xf32>
    %379 = math.exp %378 : vector<8x32xf32>
    %cst_86 = arith.constant 1.000000e+00 : f32
    %380 = vector.broadcast %cst_86 : f32 to vector<8x32xf32>
    %381 = arith.addf %380, %379 : vector<8x32xf32>
    %382 = arith.divf %380, %381 : vector<8x32xf32>
    %383 = arith.mulf %374, %322 : vector<8x32xf32>
    %384 = arith.mulf %368, %376 : vector<8x32xf32>
    %385 = arith.addf %383, %384 : vector<8x32xf32>
    %386 = math.tanh %385 : vector<8x32xf32>
    %387 = arith.mulf %382, %386 : vector<8x32xf32>
    %388 = arith.index_cast %c5_i32 : i32 to index
    %c0_87 = arith.constant 0 : index
    %c0_88 = arith.constant 0 : index
    %389 = vector.load %arg7[%388, %c0_87, %c0_88] : memref<8x8x32xf32, #tpu.memory_space<vmem>>, vector<1x8x32xf32>
    %390 = vector.shape_cast %389 : vector<1x8x32xf32> to vector<8x32xf32>
    %391 = vector.shape_cast %387 : vector<8x32xf32> to vector<1x8x32xf32>
    tpu.vector_store %arg7[%388, %c0_87, %c0_88], %391 {strides = array<i32>} : memref<8x8x32xf32, #tpu.memory_space<vmem>>, vector<1x8x32xf32>,
    %c6_i32 = arith.constant 6 : i32
    %392 = arith.index_cast %c6_i32 : i32 to index
    %c0_89 = arith.constant 0 : index
    %c0_90 = arith.constant 0 : index
    %393 = vector.load %arg1[%392, %c0_89, %c0_90] : memref<8x8x128xf32, #tpu.memory_space<vmem>>, vector<1x8x128xf32>
    %394 = vector.shape_cast %393 : vector<1x8x128xf32> to vector<8x128xf32>
    %cst_91 = arith.constant dense<0.000000e+00> : vector<8x128xf32>
    %395 = tpu.matmul %358, %3, %cst_91 {dimension_numbers = #tpu.dot_dimension_numbers<[1], [0], [0], [1], [0, 0, 1, 1], [], []>} : vector<8x32xf32>, vector<32x128xf32>, vector<8x128xf32> -> vector<8x128xf32>
    %396 = arith.addf %394, %395 : vector<8x128xf32>
    %397 = vector.extract_strided_slice %396 {offsets = [0, 0], sizes = [8, 32], strides = [1, 1]} : vector<8x128xf32> to vector<8x32xf32>
    %398 = arith.negf %397 : vector<8x32xf32>
    %399 = math.exp %398 : vector<8x32xf32>
    %cst_92 = arith.constant 1.000000e+00 : f32
    %400 = vector.broadcast %cst_92 : f32 to vector<8x32xf32>
    %401 = arith.addf %400, %399 : vector<8x32xf32>
    %402 = arith.divf %400, %401 : vector<8x32xf32>
    %403 = vector.extract_strided_slice %396 {offsets = [0, 32], sizes = [8, 32], strides = [1, 1]} : vector<8x128xf32> to vector<8x32xf32>
    %404 = arith.negf %403 : vector<8x32xf32>
    %405 = math.exp %404 : vector<8x32xf32>
    %cst_93 = arith.constant 1.000000e+00 : f32
    %406 = vector.broadcast %cst_93 : f32 to vector<8x32xf32>
    %407 = arith.addf %406, %405 : vector<8x32xf32>
    %408 = arith.divf %406, %407 : vector<8x32xf32>
    %409 = vector.extract_strided_slice %396 {offsets = [0, 64], sizes = [8, 32], strides = [1, 1]} : vector<8x128xf32> to vector<8x32xf32>
    %410 = math.tanh %409 : vector<8x32xf32>
    %411 = vector.extract_strided_slice %396 {offsets = [0, 96], sizes = [8, 32], strides = [1, 1]} : vector<8x128xf32> to vector<8x32xf32>
    %412 = arith.negf %411 : vector<8x32xf32>
    %413 = math.exp %412 : vector<8x32xf32>
    %cst_94 = arith.constant 1.000000e+00 : f32
    %414 = vector.broadcast %cst_94 : f32 to vector<8x32xf32>
    %415 = arith.addf %414, %413 : vector<8x32xf32>
    %416 = arith.divf %414, %415 : vector<8x32xf32>
    %417 = arith.mulf %408, %356 : vector<8x32xf32>
    %418 = arith.mulf %402, %410 : vector<8x32xf32>
    %419 = arith.addf %417, %418 : vector<8x32xf32>
    %420 = math.tanh %419 : vector<8x32xf32>
    %421 = arith.mulf %416, %420 : vector<8x32xf32>
    %422 = tpu.concatenate %421, %387 in 1 : vector<8x32xf32>, vector<8x32xf32> -> vector<8x64xf32>
    %cst_95 = arith.constant dense<0.000000e+00> : vector<8x128xf32>
    %423 = tpu.matmul %422, %4, %cst_95 {dimension_numbers = #tpu.dot_dimension_numbers<[1], [0], [0], [1], [0, 0, 1, 1], [], []>} : vector<8x64xf32>, vector<64x128xf32>, vector<8x128xf32> -> vector<8x128xf32>
    %424 = vector.broadcast %5 : vector<1x128xf32> to vector<8x128xf32>
    %425 = arith.addf %423, %424 : vector<8x128xf32>
    %426 = vector.extract_strided_slice %425 {offsets = [0, 0], sizes = [8, 32], strides = [1, 1]} : vector<8x128xf32> to vector<8x32xf32>
    %427 = arith.negf %426 : vector<8x32xf32>
    %428 = math.exp %427 : vector<8x32xf32>
    %cst_96 = arith.constant 1.000000e+00 : f32
    %429 = vector.broadcast %cst_96 : f32 to vector<8x32xf32>
    %430 = arith.addf %429, %428 : vector<8x32xf32>
    %431 = arith.divf %429, %430 : vector<8x32xf32>
    %432 = vector.extract_strided_slice %425 {offsets = [0, 32], sizes = [8, 32], strides = [1, 1]} : vector<8x128xf32> to vector<8x32xf32>
    %433 = arith.negf %432 : vector<8x32xf32>
    %434 = math.exp %433 : vector<8x32xf32>
    %cst_97 = arith.constant 1.000000e+00 : f32
    %435 = vector.broadcast %cst_97 : f32 to vector<8x32xf32>
    %436 = arith.addf %435, %434 : vector<8x32xf32>
    %437 = arith.divf %435, %436 : vector<8x32xf32>
    %438 = vector.extract_strided_slice %425 {offsets = [0, 64], sizes = [8, 32], strides = [1, 1]} : vector<8x128xf32> to vector<8x32xf32>
    %439 = math.tanh %438 : vector<8x32xf32>
    %440 = vector.extract_strided_slice %425 {offsets = [0, 96], sizes = [8, 32], strides = [1, 1]} : vector<8x128xf32> to vector<8x32xf32>
    %441 = arith.negf %440 : vector<8x32xf32>
    %442 = math.exp %441 : vector<8x32xf32>
    %cst_98 = arith.constant 1.000000e+00 : f32
    %443 = vector.broadcast %cst_98 : f32 to vector<8x32xf32>
    %444 = arith.addf %443, %442 : vector<8x32xf32>
    %445 = arith.divf %443, %444 : vector<8x32xf32>
    %446 = arith.mulf %437, %385 : vector<8x32xf32>
    %447 = arith.mulf %431, %439 : vector<8x32xf32>
    %448 = arith.addf %446, %447 : vector<8x32xf32>
    %449 = math.tanh %448 : vector<8x32xf32>
    %450 = arith.mulf %445, %449 : vector<8x32xf32>
    %451 = arith.index_cast %c6_i32 : i32 to index
    %c0_99 = arith.constant 0 : index
    %c0_100 = arith.constant 0 : index
    %452 = vector.load %arg7[%451, %c0_99, %c0_100] : memref<8x8x32xf32, #tpu.memory_space<vmem>>, vector<1x8x32xf32>
    %453 = vector.shape_cast %452 : vector<1x8x32xf32> to vector<8x32xf32>
    %454 = vector.shape_cast %450 : vector<8x32xf32> to vector<1x8x32xf32>
    tpu.vector_store %arg7[%451, %c0_99, %c0_100], %454 {strides = array<i32>} : memref<8x8x32xf32, #tpu.memory_space<vmem>>, vector<1x8x32xf32>,
    %c7_i32 = arith.constant 7 : i32
    %455 = arith.index_cast %c7_i32 : i32 to index
    %c0_101 = arith.constant 0 : index
    %c0_102 = arith.constant 0 : index
    %456 = vector.load %arg1[%455, %c0_101, %c0_102] : memref<8x8x128xf32, #tpu.memory_space<vmem>>, vector<1x8x128xf32>
    %457 = vector.shape_cast %456 : vector<1x8x128xf32> to vector<8x128xf32>
    %cst_103 = arith.constant dense<0.000000e+00> : vector<8x128xf32>
    %458 = tpu.matmul %421, %3, %cst_103 {dimension_numbers = #tpu.dot_dimension_numbers<[1], [0], [0], [1], [0, 0, 1, 1], [], []>} : vector<8x32xf32>, vector<32x128xf32>, vector<8x128xf32> -> vector<8x128xf32>
    %459 = arith.addf %457, %458 : vector<8x128xf32>
    %460 = vector.extract_strided_slice %459 {offsets = [0, 0], sizes = [8, 32], strides = [1, 1]} : vector<8x128xf32> to vector<8x32xf32>
    %461 = arith.negf %460 : vector<8x32xf32>
    %462 = math.exp %461 : vector<8x32xf32>
    %cst_104 = arith.constant 1.000000e+00 : f32
    %463 = vector.broadcast %cst_104 : f32 to vector<8x32xf32>
    %464 = arith.addf %463, %462 : vector<8x32xf32>
    %465 = arith.divf %463, %464 : vector<8x32xf32>
    %466 = vector.extract_strided_slice %459 {offsets = [0, 32], sizes = [8, 32], strides = [1, 1]} : vector<8x128xf32> to vector<8x32xf32>
    %467 = arith.negf %466 : vector<8x32xf32>
    %468 = math.exp %467 : vector<8x32xf32>
    %cst_105 = arith.constant 1.000000e+00 : f32
    %469 = vector.broadcast %cst_105 : f32 to vector<8x32xf32>
    %470 = arith.addf %469, %468 : vector<8x32xf32>
    %471 = arith.divf %469, %470 : vector<8x32xf32>
    %472 = vector.extract_strided_slice %459 {offsets = [0, 64], sizes = [8, 32], strides = [1, 1]} : vector<8x128xf32> to vector<8x32xf32>
    %473 = math.tanh %472 : vector<8x32xf32>
    %474 = vector.extract_strided_slice %459 {offsets = [0, 96], sizes = [8, 32], strides = [1, 1]} : vector<8x128xf32> to vector<8x32xf32>
    %475 = arith.negf %474 : vector<8x32xf32>
    %476 = math.exp %475 : vector<8x32xf32>
    %cst_106 = arith.constant 1.000000e+00 : f32
    %477 = vector.broadcast %cst_106 : f32 to vector<8x32xf32>
    %478 = arith.addf %477, %476 : vector<8x32xf32>
    %479 = arith.divf %477, %478 : vector<8x32xf32>
    %480 = arith.mulf %471, %419 : vector<8x32xf32>
    %481 = arith.mulf %465, %473 : vector<8x32xf32>
    %482 = arith.addf %480, %481 : vector<8x32xf32>
    %483 = math.tanh %482 : vector<8x32xf32>
    %484 = arith.mulf %479, %483 : vector<8x32xf32>
    %485 = tpu.concatenate %484, %450 in 1 : vector<8x32xf32>, vector<8x32xf32> -> vector<8x64xf32>
    %cst_107 = arith.constant dense<0.000000e+00> : vector<8x128xf32>
    %486 = tpu.matmul %485, %4, %cst_107 {dimension_numbers = #tpu.dot_dimension_numbers<[1], [0], [0], [1], [0, 0, 1, 1], [], []>} : vector<8x64xf32>, vector<64x128xf32>, vector<8x128xf32> -> vector<8x128xf32>
    %487 = vector.broadcast %5 : vector<1x128xf32> to vector<8x128xf32>
    %488 = arith.addf %486, %487 : vector<8x128xf32>
    %489 = vector.extract_strided_slice %488 {offsets = [0, 0], sizes = [8, 32], strides = [1, 1]} : vector<8x128xf32> to vector<8x32xf32>
    %490 = arith.negf %489 : vector<8x32xf32>
    %491 = math.exp %490 : vector<8x32xf32>
    %cst_108 = arith.constant 1.000000e+00 : f32
    %492 = vector.broadcast %cst_108 : f32 to vector<8x32xf32>
    %493 = arith.addf %492, %491 : vector<8x32xf32>
    %494 = arith.divf %492, %493 : vector<8x32xf32>
    %495 = vector.extract_strided_slice %488 {offsets = [0, 32], sizes = [8, 32], strides = [1, 1]} : vector<8x128xf32> to vector<8x32xf32>
    %496 = arith.negf %495 : vector<8x32xf32>
    %497 = math.exp %496 : vector<8x32xf32>
    %cst_109 = arith.constant 1.000000e+00 : f32
    %498 = vector.broadcast %cst_109 : f32 to vector<8x32xf32>
    %499 = arith.addf %498, %497 : vector<8x32xf32>
    %500 = arith.divf %498, %499 : vector<8x32xf32>
    %501 = vector.extract_strided_slice %488 {offsets = [0, 64], sizes = [8, 32], strides = [1, 1]} : vector<8x128xf32> to vector<8x32xf32>
    %502 = math.tanh %501 : vector<8x32xf32>
    %503 = vector.extract_strided_slice %488 {offsets = [0, 96], sizes = [8, 32], strides = [1, 1]} : vector<8x128xf32> to vector<8x32xf32>
    %504 = arith.negf %503 : vector<8x32xf32>
    %505 = math.exp %504 : vector<8x32xf32>
    %cst_110 = arith.constant 1.000000e+00 : f32
    %506 = vector.broadcast %cst_110 : f32 to vector<8x32xf32>
    %507 = arith.addf %506, %505 : vector<8x32xf32>
    %508 = arith.divf %506, %507 : vector<8x32xf32>
    %509 = arith.mulf %500, %448 : vector<8x32xf32>
    %510 = arith.mulf %494, %502 : vector<8x32xf32>
    %511 = arith.addf %509, %510 : vector<8x32xf32>
    %512 = math.tanh %511 : vector<8x32xf32>
    %513 = arith.mulf %508, %512 : vector<8x32xf32>
    %514 = arith.index_cast %c7_i32 : i32 to index
    %c0_111 = arith.constant 0 : index
    %c0_112 = arith.constant 0 : index
    %515 = vector.load %arg7[%514, %c0_111, %c0_112] : memref<8x8x32xf32, #tpu.memory_space<vmem>>, vector<1x8x32xf32>
    %516 = vector.shape_cast %515 : vector<1x8x32xf32> to vector<8x32xf32>
    %517 = vector.shape_cast %513 : vector<8x32xf32> to vector<1x8x32xf32>
    tpu.vector_store %arg7[%514, %c0_111, %c0_112], %517 {strides = array<i32>} : memref<8x8x32xf32, #tpu.memory_space<vmem>>, vector<1x8x32xf32>,
    %c8_i32 = arith.constant 8 : i32
    %c0_113 = arith.constant 0 : index
    %c0_114 = arith.constant 0 : index
    %c0_115 = arith.constant 0 : index
    %518 = vector.load %arg10[%c0_113, %c0_114, %c0_115] : memref<2x8x32xf32, #tpu.memory_space<vmem>>, vector<1x8x32xf32>
    %519 = vector.shape_cast %518 : vector<1x8x32xf32> to vector<8x32xf32>
    %520 = vector.shape_cast %484 : vector<8x32xf32> to vector<1x8x32xf32>
    tpu.vector_store %arg10[%c0_113, %c0_114, %c0_115], %520 {strides = array<i32>} : memref<2x8x32xf32, #tpu.memory_space<vmem>>, vector<1x8x32xf32>,
    %c1_116 = arith.constant 1 : index
    %c0_117 = arith.constant 0 : index
    %c0_118 = arith.constant 0 : index
    %521 = vector.load %arg10[%c1_116, %c0_117, %c0_118] : memref<2x8x32xf32, #tpu.memory_space<vmem>>, vector<1x8x32xf32>
    %522 = vector.shape_cast %521 : vector<1x8x32xf32> to vector<8x32xf32>
    %523 = vector.shape_cast %513 : vector<8x32xf32> to vector<1x8x32xf32>
    tpu.vector_store %arg10[%c1_116, %c0_117, %c0_118], %523 {strides = array<i32>} : memref<2x8x32xf32, #tpu.memory_space<vmem>>, vector<1x8x32xf32>,
    %c0_119 = arith.constant 0 : index
    %c0_120 = arith.constant 0 : index
    %c0_121 = arith.constant 0 : index
    %524 = vector.load %arg11[%c0_119, %c0_120, %c0_121] : memref<2x8x32xf32, #tpu.memory_space<vmem>>, vector<1x8x32xf32>
    %525 = vector.shape_cast %524 : vector<1x8x32xf32> to vector<8x32xf32>
    %526 = vector.shape_cast %482 : vector<8x32xf32> to vector<1x8x32xf32>
    tpu.vector_store %arg11[%c0_119, %c0_120, %c0_121], %526 {strides = array<i32>} : memref<2x8x32xf32, #tpu.memory_space<vmem>>, vector<1x8x32xf32>,
    %c1_122 = arith.constant 1 : index
    %c0_123 = arith.constant 0 : index
    %c0_124 = arith.constant 0 : index
    %527 = vector.load %arg11[%c1_122, %c0_123, %c0_124] : memref<2x8x32xf32, #tpu.memory_space<vmem>>, vector<1x8x32xf32>
    %528 = vector.shape_cast %527 : vector<1x8x32xf32> to vector<8x32xf32>
    %529 = vector.shape_cast %511 : vector<8x32xf32> to vector<1x8x32xf32>
    tpu.vector_store %arg11[%c1_122, %c0_123, %c0_124], %529 {strides = array<i32>} : memref<2x8x32xf32, #tpu.memory_space<vmem>>, vector<1x8x32xf32>,
    %c0_i32_125 = arith.constant 0 : i32
    %530 = arith.cmpi eq, %arg0, %c0_i32_125 : i32
    %531 = arith.extui %530 : i1 to i32
    %c0_i32_126 = arith.constant 0 : i32
    %532 = arith.cmpi ne, %531, %c0_i32_126 : i32
    scf.if %532 {
      %c0_127 = arith.constant 0 : index
      %c0_128 = arith.constant 0 : index
      %c0_129 = arith.constant 0 : index
      %533 = vector.load %arg8[%c0_127, %c0_128, %c0_129] : memref<2x8x32xf32, #tpu.memory_space<vmem>>, vector<1x8x32xf32>
      %534 = vector.shape_cast %533 : vector<1x8x32xf32> to vector<8x32xf32>
      %535 = vector.shape_cast %484 : vector<8x32xf32> to vector<1x8x32xf32>
      tpu.vector_store %arg8[%c0_127, %c0_128, %c0_129], %535 {strides = array<i32>} : memref<2x8x32xf32, #tpu.memory_space<vmem>>, vector<1x8x32xf32>,
      %c1_130 = arith.constant 1 : index
      %c0_131 = arith.constant 0 : index
      %c0_132 = arith.constant 0 : index
      %536 = vector.load %arg8[%c1_130, %c0_131, %c0_132] : memref<2x8x32xf32, #tpu.memory_space<vmem>>, vector<1x8x32xf32>
      %537 = vector.shape_cast %536 : vector<1x8x32xf32> to vector<8x32xf32>
      %538 = vector.shape_cast %513 : vector<8x32xf32> to vector<1x8x32xf32>
      tpu.vector_store %arg8[%c1_130, %c0_131, %c0_132], %538 {strides = array<i32>} : memref<2x8x32xf32, #tpu.memory_space<vmem>>, vector<1x8x32xf32>,
      %c0_133 = arith.constant 0 : index
      %c0_134 = arith.constant 0 : index
      %c0_135 = arith.constant 0 : index
      %539 = vector.load %arg9[%c0_133, %c0_134, %c0_135] : memref<2x8x32xf32, #tpu.memory_space<vmem>>, vector<1x8x32xf32>
      %540 = vector.shape_cast %539 : vector<1x8x32xf32> to vector<8x32xf32>
      %541 = vector.shape_cast %482 : vector<8x32xf32> to vector<1x8x32xf32>
      tpu.vector_store %arg9[%c0_133, %c0_134, %c0_135], %541 {strides = array<i32>} : memref<2x8x32xf32, #tpu.memory_space<vmem>>, vector<1x8x32xf32>,
      %c1_136 = arith.constant 1 : index
      %c0_137 = arith.constant 0 : index
      %c0_138 = arith.constant 0 : index
      %542 = vector.load %arg9[%c1_136, %c0_137, %c0_138] : memref<2x8x32xf32, #tpu.memory_space<vmem>>, vector<1x8x32xf32>
      %543 = vector.shape_cast %542 : vector<1x8x32xf32> to vector<8x32xf32>
      %544 = vector.shape_cast %511 : vector<8x32xf32> to vector<1x8x32xf32>
      tpu.vector_store %arg9[%c1_136, %c0_137, %c0_138], %544 {strides = array<i32>} : memref<2x8x32xf32, #tpu.memory_space<vmem>>, vector<1x8x32xf32>,
    } else {
    }
    return
  }
  func.func @transform_0(%arg0: i32) -> (i32, i32, i32) {
    %c0_i32 = arith.constant 0 : i32
    %c0_i32_0 = arith.constant 0 : i32
    %c0_i32_1 = arith.constant 0 : i32
    return %arg0, %c0_i32, %c0_i32_0 : i32, i32, i32
  }
  func.func @transform_1(%arg0: i32) -> (i32, i32, i32) {
    %c0_i32 = arith.constant 0 : i32
    %c0_i32_0 = arith.constant 0 : i32
    %c0_i32_1 = arith.constant 0 : i32
    %c0_i32_2 = arith.constant 0 : i32
    return %c0_i32, %c0_i32_0, %c0_i32_1 : i32, i32, i32
  }
  func.func @transform_2(%arg0: i32) -> (i32, i32, i32) {
    %c0_i32 = arith.constant 0 : i32
    %c0_i32_0 = arith.constant 0 : i32
    %c0_i32_1 = arith.constant 0 : i32
    %c0_i32_2 = arith.constant 0 : i32
    return %c0_i32, %c0_i32_0, %c0_i32_1 : i32, i32, i32
  }
  func.func @transform_3(%arg0: i32) -> (i32, i32) {
    %c0_i32 = arith.constant 0 : i32
    %c0_i32_0 = arith.constant 0 : i32
    %c0_i32_1 = arith.constant 0 : i32
    return %c0_i32, %c0_i32_0 : i32, i32
  }
  func.func @transform_4(%arg0: i32) -> (i32, i32) {
    %c0_i32 = arith.constant 0 : i32
    %c0_i32_0 = arith.constant 0 : i32
    %c0_i32_1 = arith.constant 0 : i32
    return %c0_i32, %c0_i32_0 : i32, i32
  }
  func.func @transform_5(%arg0: i32) -> (i32, i32) {
    %c0_i32 = arith.constant 0 : i32
    %c0_i32_0 = arith.constant 0 : i32
    %c0_i32_1 = arith.constant 0 : i32
    return %c0_i32, %c0_i32_0 : i32, i32
  }
  func.func @transform_6(%arg0: i32) -> (i32, i32, i32) {
    %c0_i32 = arith.constant 0 : i32
    %c0_i32_0 = arith.constant 0 : i32
    %c0_i32_1 = arith.constant 0 : i32
    return %arg0, %c0_i32, %c0_i32_0 : i32, i32, i32
  }
  func.func @transform_7(%arg0: i32) -> (i32, i32, i32) {
    %c0_i32 = arith.constant 0 : i32
    %c0_i32_0 = arith.constant 0 : i32
    %c0_i32_1 = arith.constant 0 : i32
    %c0_i32_2 = arith.constant 0 : i32
    return %c0_i32, %c0_i32_0, %c0_i32_1 : i32, i32, i32
  }
  func.func @transform_8(%arg0: i32) -> (i32, i32, i32) {
    %c0_i32 = arith.constant 0 : i32
    %c0_i32_0 = arith.constant 0 : i32
    %c0_i32_1 = arith.constant 0 : i32
    %c0_i32_2 = arith.constant 0 : i32
    return %c0_i32, %c0_i32_0, %c0_i32_1 : i32, i32, i32
  }
}

</mosaic_0001>

<bundles_post_ra>
// kernel: rnn_decoder_forward.1
= control target key start
LH: loop header
LB: loop body
LE: loop exit
PB: predicated region body
PF: predicated region fallthrough
CT: control target
= control target key end

     0   :  { %vm32_vm0 = vcmask 261120   ;;  %s1373_s18 = smov 64   ;;  %s1374_s19 = smov 32   ;;  %vm137_vm5 = vcmask 523264   ;;  %s1862_s3 = inlined_call_operand.vmem [shape: f32[32,128], index: 3, kind: input, shape index: {}]   ;;  %s1863_s1 = inlined_call_operand.vmem [shape: f32[2,8,32], index: 1, kind: input, shape index: {}]   ;;  %s1864_s2 = inlined_call_operand.vmem [shape: f32[2,8,32], index: 2, kind: input, shape index: {}]   ;;  %s1865_s0 = inlined_call_operand.vmem [shape: f32[8,8,128], index: 0, kind: input, shape index: {}]   ;;  %s1866_s4 = inlined_call_operand.vmem [shape: f32[64,128], index: 4, kind: input, shape index: {}]   ;;  %s1867_s5 = inlined_call_operand.vmem [shape: f32[1,128], index: 5, kind: input, shape index: {}]   ;;  %s1868_s7 = inlined_call_operand.vmem [shape: f32[2,8,32], index: 7, kind: output, shape index: {1}]   ;;  %s1869_s6 = inlined_call_operand.vmem [shape: f32[8,8,32], index: 6, kind: output, shape index: {0}]   ;;  %s1870_s8 = inlined_call_operand.vmem [shape: f32[2,8,32], index: 8, kind: output, shape index: {2}]  }
   0x1   :  { %v1424_v0 = vld [vmem:[%s1862_s3 + $0x18] sm:$0xff]  ;;  %v1429_v1 = vld [vmem:[%s1862_s3 + $0x10] sm:$0xff]  ;;  %v30_v2 = vld [vmem:[%s1863_s1] sm:$0xff] }
   0x2   :  { %75 = vmatpush.msra.mxu0 %v1424_v0  ;;  %223 = vmatpush.msra.mxu2 %v1424_v0  ;;  %v1439_v3 = vld [vmem:[%s1862_s3 + $0x8] sm:$0xff]  ;;  %33 = vst.msk [vmem:[#allocation2] sm:$0xff] %vm32_vm0, %v30_v2  ;;  %v1447_v4 = vld [vmem:[%s1862_s3] sm:$0xff]  ;;  %v1483_v33 = vld [vmem:[%s1866_s4 + $0x38] sm:$0xff] }
   0x3   :  { %v35_v6 = vld [vmem:[%s1864_s2] sm:$0xff]  ;;  %v31_v32 = vld [vmem:[%s1863_s1 + $0x8] sm:$0xff]  ;;  %v1488_v34 = vld [vmem:[%s1866_s4 + $0x30] sm:$0xff]  ;;  %149 = vmatpush.msra.mxu1 %v1483_v33  ;;  %288 = vmatpush.msra.mxu3 %v1483_v33 }
   0x4   :  { %76 = vmatpush.msra.mxu0 %v1429_v1  ;;  %224 = vmatpush.msra.mxu2 %v1429_v1  ;;  %37 = vst.msk [vmem:[#allocation3] sm:$0xff] %vm32_vm0, %v35_v6  ;;  %v58_v7 = vld [vmem:[%s1865_s0] sm:$0xff]  ;;  %v1495_v35 = vld [vmem:[%s1866_s4 + $0x28] sm:$0xff]  ;;  %v1515_v40 = vld [vmem:[%s1866_s4 + $0x18] sm:$0xff] }
   0x5   :  { %34 = vst.msk [vmem:[#allocation2 + $0x8] sm:$0xff] %vm32_vm0, %v31_v32  ;;  %150 = vmatpush.msra.mxu1 %v1488_v34  ;;  %289 = vmatpush.msra.mxu3 %v1488_v34  ;;  %v1509_v39 = vld [vmem:[%s1866_s4 + $0x20] sm:$0xff]  ;;  %v1521_v41 = vld [vmem:[%s1866_s4 + $0x10] sm:$0xff]  ;;  %v1529_v42 = vld [vmem:[%s1866_s4 + $0x8] sm:$0xff] }
   0x6   :  { %77 = vmatpush.msra.mxu0 %v1439_v3  ;;  %225 = vmatpush.msra.mxu2 %v1439_v3  ;;  %v1540_v43 = vld [vmem:[%s1866_s4] sm:$0xff]  ;;  %v36_v44 = vld [vmem:[%s1864_s2 + $0x8] sm:$0xff]  ;;  %s1375_s2 = smov 96  }
   0x7   :  { %151 = vmatpush.msra.mxu1 %v1495_v35  ;;  %290 = vmatpush.msra.mxu3 %v1495_v35  ;;  %38 = vst.msk [vmem:[#allocation3 + $0x8] sm:$0xff] %vm32_vm0, %v36_v44  ;;  %v1196_v49 = vld [vmem:[%s1865_s0 + $0x8] sm:$0xff]  ;;  %v1584_v51 = vld [vmem:[%s1867_s5] ss:$0 sm:$0xff] }
   0x8   :  { %78 = vmatpush.msra.mxu0 %v1447_v4  ;;  %226 = vmatpush.msra.mxu2 %v1447_v4 }
   0x9   :  { %v52_v5 = vld [vmem:[#allocation2] sm:$0xff]  ;;  %152 = vmatpush.msra.mxu1 %v1509_v39  ;;  %291 = vmatpush.msra.mxu3 %v1509_v39 }
   0xa   :  { %359 = vmatpush.msrb.mxu0 %v1424_v0  ;;  %424 = vmatpush.msrb.mxu2 %v1483_v33 }
   0xb   :  { %1192 = vmatmul.msk.f32.vlgmr.msra.gmra.mxu0 %vm32_vm0, %v52_v5  ;;  %v53_v11 = vld [vmem:[#allocation3] sm:$0xff]  ;;  %153 = vmatpush.msra.mxu1 %v1515_v40 }
   0xc   :  { %360 = vmatpush.msrb.mxu0 %v1429_v1  ;;  %425 = vmatpush.msrb.mxu2 %v1488_v34  ;;  %v55_v38 = vld [vmem:[#allocation2 + $0x8] sm:$0xff] }
   0xd   :  { %292 = vmatpush.msra.mxu3 %v1515_v40  ;;  %154 = vmatpush.msra.mxu1 %v1521_v41 }
   0xe   :  { %361 = vmatpush.msrb.mxu0 %v1439_v3  ;;  %426 = vmatpush.msrb.mxu2 %v1495_v35  ;;  %v57_v45 = vld [vmem:[#allocation3 + $0x8] sm:$0xff] }
   0xf   :  { %293 = vmatpush.msra.mxu3 %v1521_v41  ;;  %155 = vmatpush.msra.mxu1 %v1529_v42 }
  0x10   :  { %362 = vmatpush.msrb.mxu0 %v1447_v4  ;;  %427 = vmatpush.msrb.mxu2 %v1509_v39 }
  0x11   :  { %294 = vmatpush.msra.mxu3 %v1529_v42  ;;  %156 = vmatpush.msra.mxu1 %v1540_v43 }
  0x12   :  { %495 = vmatpush.msra.mxu0 %v1424_v0  ;;  %428 = vmatpush.msrb.mxu2 %v1515_v40 }
  0x13   :  { %295 = vmatpush.msra.mxu3 %v1540_v43  ;;  %560 = vmatpush.msrb.mxu1 %v1483_v33 }
  0x14   :  { %496 = vmatpush.msra.mxu0 %v1429_v1  ;;  %429 = vmatpush.msrb.mxu2 %v1521_v41 }
  0x15   :  { %631 = vmatpush.msrb.mxu3 %v1424_v0  ;;  %561 = vmatpush.msrb.mxu1 %v1488_v34 }
  0x16   :  { %497 = vmatpush.msra.mxu0 %v1439_v3  ;;  %430 = vmatpush.msrb.mxu2 %v1529_v42 }
  0x17   :  { %632 = vmatpush.msrb.mxu3 %v1429_v1  ;;  %562 = vmatpush.msrb.mxu1 %v1495_v35 }
  0x18   :  { %498 = vmatpush.msra.mxu0 %v1447_v4  ;;  %431 = vmatpush.msrb.mxu2 %v1540_v43 }
  0x19   :  { %633 = vmatpush.msrb.mxu3 %v1439_v3  ;;  %563 = vmatpush.msrb.mxu1 %v1509_v39 }
  0x1b   :  { %634 = vmatpush.msrb.mxu3 %v1447_v4  ;;  %564 = vmatpush.msrb.mxu1 %v1515_v40 }
  0x1d   :  { %565 = vmatpush.msrb.mxu1 %v1521_v41 }
  0x1f   :  { %566 = vmatpush.msrb.mxu1 %v1529_v42 }
  0x21   :  { %567 = vmatpush.msrb.mxu1 %v1540_v43 }
  0x88   :  { %v80_v8 = vpop.f32.mrf.mxu0 }
  0x89   :  { %v83_v9 = vadd.f32 %v80_v8, %v58_v7 }
  0x8b   :  { %1244 = vtanh.f32 %v83_v9  ;;  %v1193_v12 = vmul.f32 -1.442695, %v83_v9 }
  0x8d   :  { %1246 = vpow2.f32 %v1193_v12 }
  0x91   :  { %v1245_v10 = vpop.eup %1244 }
  0x92   :  { %110 = vrot.lane.b32.xlu0 %v1245_v10, %s1373_s18 }
  0x93   :  { %v1247_v13 = vpop.eup %1246 }
  0x94   :  { %v87_v14 = vadd.f32 1.0, %v1247_v13 }
  0x96   :  { %1248 = vrcp.f32 %v87_v14  ;;  %v99_v20 = vand.u32 2147483648, %v87_v14  ;;  %vm93_vm2 = vweird.f32 %v87_v14  ;;  %v97_v21 = vand.u32 2147483647, %v87_v14 }
  0x98   :  { %v100_v23 = vor.u32 1.1754944e-38, %v99_v20  ;;  %vm98_vm4 = vcmp.eq.f32.partialorder %v97_v21, 8.507059e+37 }
  0x9a   :  { %105 = vrot.lane.b32.xlu0 %v53_v11, %s1374_s19 }
  0x9c   :  { %v1249_v15 = vpop.eup %1248 }
  0x9d   :  { %v89_v16 = vmul.f32 %v1249_v15, %v87_v14  ;;  %vm94_vm1 = vweird.f32 %v1249_v15 }
  0x9e   :  { %vm95_vm3 = vmor %vm93_vm2, %vm94_vm1 }
  0x9f   :  { %v90_v17 = vsub.f32 1.0, %v89_v16 }
  0xa1   :  { %v91_v18 = vmul.f32 %v1249_v15, %v90_v17 }
  0xa3   :  { %v92_v19 = vadd.f32 %v1249_v15, %v91_v18 }
  0xa5   :  { %v96_v22 = vsel %vm95_vm3, %v1249_v15, %v92_v19 }
  0xa6   :  { %v101_v25 = vsel %vm98_vm4, %v100_v23, %v96_v22 }
 0x104   :  { %v111_v24 = vpop.permute.xlu0 %110 }
 0x105   :  { %v113_v26 = vmul.f32 %v111_v24, %v101_v25 }
 0x107   :  { %115 = vrot.lane.b32.xlu1 %v113_v26, %s1374_s19 }
 0x10c   :  { %v106_v27 = vpop.permute.xlu0 %105 }
 0x10d   :  { %v108_v28 = vmul.f32 %v106_v27, %v101_v25 }
 0x179   :  { %v116_v29 = vpop.permute.xlu1 %115 }
 0x17a   :  { %v1472_v30 = vadd.f32 %v116_v29, %v108_v28 }
 0x17c   :  { %1250 = vtanh.f32 %v1472_v30 }
 0x182   :  { %v1251_v31 = vpop.eup %1250 }
 0x183   :  { %121 = vrot.lane.b32.xlu1 %v1251_v31, %s1373_s18 }
 0x1f5   :  { %v122_v36 = vpop.permute.xlu1 %121 }
 0x1f6   :  { %v124_v37 = vmul.f32 %v122_v36, %v101_v25 }
 0x1f8   :  { %126 = vrot.lane.b32.xlu2 %v124_v37, %s1374_s19 }
 0x200   :  { %130 = vrot.lane.b32.xlu2 %v55_v38, %s1374_s19 }
 0x208   :  { %182 = vrot.lane.b32.xlu2 %v57_v45, %s1374_s19 }
 0x252   :  { %v127_v46 = vpop.permute.xlu2 %126 }
 0x253   :  { %1197 = vmatmul.msk.f32.vlgmr.msra.gmra.mxu2 %vm32_vm0, %v127_v46 }
 0x254   :  { %767 = vmatpush.msra.mxu2 %v1424_v0 }
 0x256   :  { %768 = vmatpush.msra.mxu2 %v1429_v1 }
 0x258   :  { %769 = vmatpush.msra.mxu2 %v1439_v3 }
 0x25a   :  { %v131_v47 = vpop.permute.xlu2 %130  ;;  %770 = vmatpush.msra.mxu2 %v1447_v4 }
 0x25b   :  { %v133_v48 = vsel %vm32_vm0, %v127_v46, %v131_v47 }
 0x25c   :  { %1194 = vmatmul.msk.f32.vlgmr.msra.gmra.mxu1 %vm137_vm5, %v133_v48 }
 0x25d   :  { %1104 = vmatpush.msra.mxu1 %v1483_v33 }
 0x25f   :  { %1105 = vmatpush.msra.mxu1 %v1488_v34 }
 0x261   :  { %1106 = vmatpush.msra.mxu1 %v1495_v35 }
 0x262   :  { %v183_v27 = vpop.permute.xlu2 %182 }
 0x263   :  { %1107 = vmatpush.msra.mxu1 %v1509_v39 }
 0x265   :  { %1108 = vmatpush.msra.mxu1 %v1515_v40 }
 0x267   :  { %1109 = vmatpush.msra.mxu1 %v1521_v41 }
 0x269   :  { %1110 = vmatpush.msra.mxu1 %v1529_v42 }
 0x26b   :  { %1111 = vmatpush.msra.mxu1 %v1540_v43 }
 0x2d6   :  { %v228_v50 = vpop.f32.mrf.mxu2 }
 0x2d7   :  { %v231_v52 = vadd.f32 %v1196_v49, %v228_v50 }
 0x2d9   :  { %1252 = vtanh.f32 %v231_v52  ;;  %v158_v53 = vpop.f32.mrf.mxu1  ;;  %v1198_v57 = vmul.f32 -1.442695, %v231_v52  ;;  %v1202_v52 = vld [vmem:[%s1865_s0 + $0x10] sm:$0xff] }
 0x2da   :  { %v159_v54 = vadd.f32 %v1584_v51, %v158_v53 }
 0x2dc   :  { %1254 = vtanh.f32 %v159_v54  ;;  %v1195_v58 = vmul.f32 -1.442695, %v159_v54 }
 0x2dd   :  { %1256 = vpow2.f32 %v1198_v57 }
 0x2de   :  { %1258 = vpow2.f32 %v1195_v58 }
 0x2df   :  { %v1253_v55 = vpop.eup %1252 }
 0x2e0   :  { %254 = vrot.lane.b32.xlu1 %v1253_v55, %s1373_s18 }
 0x2e2   :  { %v1255_v56 = vpop.eup %1254 }
 0x2e3   :  { %187 = vrot.lane.b32.xlu0 %v1255_v56, %s1373_s18  ;;  %v1257_v59 = vpop.eup %1256 }
 0x2e4   :  { %v1259_v60 = vpop.eup %1258  ;;  %v235_v61 = vadd.f32 1.0, %v1257_v59 }
 0x2e5   :  { %v164_v62 = vadd.f32 1.0, %v1259_v60 }
 0x2e6   :  { %1260 = vrcp.f32 %v235_v61  ;;  %v247_v12 = vand.u32 2147483648, %v235_v61  ;;  %vm241_vm7 = vweird.f32 %v235_v61  ;;  %v245_v13 = vand.u32 2147483647, %v235_v61 }
 0x2e7   :  { %1262 = vrcp.f32 %v164_v62  ;;  %v176_v15 = vand.u32 2147483648, %v164_v62  ;;  %vm170_vm10 = vweird.f32 %v164_v62  ;;  %v174_v17 = vand.u32 2147483647, %v164_v62 }
 0x2e8   :  { %v248_v18 = vor.u32 1.1754944e-38, %v247_v12  ;;  %vm246_vm12 = vcmp.eq.f32.partialorder %v245_v13, 8.507059e+37 }
 0x2e9   :  { %v177_v22 = vor.u32 1.1754944e-38, %v176_v15  ;;  %vm175_vm13 = vcmp.eq.f32.partialorder %v174_v17, 8.507059e+37 }
 0x2ec   :  { %v1261_v63 = vpop.eup %1260 }
 0x2ed   :  { %v1263_v2 = vpop.eup %1262  ;;  %v237_v5 = vmul.f32 %v1261_v63, %v235_v61  ;;  %vm242_vm6 = vweird.f32 %v1261_v63 }
 0x2ee   :  { %v166_v6 = vmul.f32 %v1263_v2, %v164_v62  ;;  %vm171_vm8 = vweird.f32 %v1263_v2  ;;  %vm243_vm9 = vmor %vm241_vm7, %vm242_vm6 }
 0x2ef   :  { %v238_v7 = vsub.f32 1.0, %v237_v5  ;;  %vm172_vm11 = vmor %vm170_vm10, %vm171_vm8 }
 0x2f0   :  { %v167_v8 = vsub.f32 1.0, %v166_v6 }
 0x2f1   :  { %v239_v9 = vmul.f32 %v1261_v63, %v238_v7 }
 0x2f2   :  { %v168_v10 = vmul.f32 %v1263_v2, %v167_v8 }
 0x2f3   :  { %v240_v11 = vadd.f32 %v1261_v63, %v239_v9 }
 0x2f4   :  { %v169_v14 = vadd.f32 %v1263_v2, %v168_v10 }
 0x2f5   :  { %v244_v16 = vsel %vm243_vm9, %v1261_v63, %v240_v11 }
 0x2f6   :  { %v173_v19 = vsel %vm172_vm11, %v1263_v2, %v169_v14  ;;  %v249_v21 = vsel %vm246_vm12, %v248_v18, %v244_v16 }
 0x2f7   :  { %v178_v24 = vsel %vm175_vm13, %v177_v22, %v173_v19  ;;  %v252_v28 = vmul.f32 %v249_v21, %v1472_v30 }
 0x2f8   :  { %v185_v32 = vmul.f32 %v183_v27, %v178_v24 }
 0x352   :  { %v255_v20 = vpop.permute.xlu1 %254 }
 0x353   :  { %v257_v23 = vmul.f32 %v255_v20, %v249_v21 }
 0x355   :  { %259 = vrot.lane.b32.xlu1 %v257_v23, %s1374_s19  ;;  %v188_v25 = vpop.permute.xlu0 %187 }
 0x356   :  { %v190_v26 = vmul.f32 %v188_v25, %v178_v24 }
 0x358   :  { %192 = vrot.lane.b32.xlu0 %v190_v26, %s1374_s19 }
 0x3c7   :  { %v260_v29 = vpop.permute.xlu1 %259 }
 0x3c8   :  { %v1592_v31 = vadd.f32 %v260_v29, %v252_v28 }
 0x3ca   :  { %1264 = vtanh.f32 %v1592_v31  ;;  %v193_v36 = vpop.permute.xlu0 %192 }
 0x3cb   :  { %v1595_v37 = vadd.f32 %v193_v36, %v185_v32 }
 0x3cd   :  { %1266 = vtanh.f32 %v1595_v37 }
 0x3d0   :  { %v1265_v38 = vpop.eup %1264 }
 0x3d1   :  { %265 = vrot.lane.b32.xlu0 %v1265_v38, %s1373_s18 }
 0x3d3   :  { %v1267_v44 = vpop.eup %1266 }
 0x3d4   :  { %198 = vrot.lane.b32.xlu2 %v1267_v44, %s1373_s18 }
 0x42e   :  { %v199_v45 = vpop.permute.xlu2 %198 }
 0x42f   :  { %v1600_v46 = vmul.f32 %v199_v45, %v178_v24 }
 0x431   :  { %273 = vrot.lane.b32.xlu2 %v1600_v46, %s1373_s18 }
 0x443   :  { %v266_v30 = vpop.permute.xlu0 %265 }
 0x444   :  { %v268_v47 = vmul.f32 %v266_v30, %v249_v21 }
 0x446   :  { %270 = vrot.lane.b32.xlu1 %v268_v47, %s1374_s19 }
 0x48b   :  { %v274_v48 = vpop.permute.xlu2 %273 }
 0x4b8   :  { %v271_v49 = vpop.permute.xlu1 %270 }
 0x4b9   :  { %1203 = vmatmul.msk.f32.vlgmr.msrb.gmra.mxu0 %vm32_vm0, %v271_v49  ;;  %v276_v50 = vsel %vm32_vm0, %v271_v49, %v274_v48 }
 0x4ba   :  { %1199 = vmatmul.msk.f32.vlgmr.msra.gmra.mxu3 %vm137_vm5, %v276_v50  ;;  %696 = vmatpush.msrb.mxu0 %v1483_v33 }
 0x4bb   :  { %832 = vmatpush.msra.mxu3 %v1483_v33 }
 0x4bc   :  { %697 = vmatpush.msrb.mxu0 %v1488_v34 }
 0x4bd   :  { %833 = vmatpush.msra.mxu3 %v1488_v34 }
 0x4be   :  { %698 = vmatpush.msrb.mxu0 %v1495_v35 }
 0x4bf   :  { %834 = vmatpush.msra.mxu3 %v1495_v35 }
 0x4c0   :  { %699 = vmatpush.msrb.mxu0 %v1509_v39 }
 0x4c1   :  { %835 = vmatpush.msra.mxu3 %v1509_v39 }
 0x4c2   :  { %700 = vmatpush.msrb.mxu0 %v1515_v40 }
 0x4c3   :  { %836 = vmatpush.msra.mxu3 %v1515_v40 }
 0x4c4   :  { %701 = vmatpush.msrb.mxu0 %v1521_v41 }
 0x4c5   :  { %837 = vmatpush.msra.mxu3 %v1521_v41 }
 0x4c6   :  { %702 = vmatpush.msrb.mxu0 %v1529_v42 }
 0x4c7   :  { %838 = vmatpush.msra.mxu3 %v1529_v42 }
 0x4c8   :  { %703 = vmatpush.msrb.mxu0 %v1540_v43 }
 0x4c9   :  { %839 = vmatpush.msra.mxu3 %v1540_v43 }
 0x536   :  { %v364_v53 = vpop.f32.mrf.mxu0 }
 0x537   :  { %v367_v54 = vadd.f32 %v1202_v52, %v364_v53 }
 0x539   :  { %1268 = vtanh.f32 %v367_v54  ;;  %v1204_v59 = vmul.f32 -1.442695, %v367_v54  ;;  %v1208_v54 = vld [vmem:[%s1865_s0 + $0x18] sm:$0xff] }
 0x53d   :  { %v297_v55 = vpop.f32.mrf.mxu3 }
 0x53e   :  { %v298_v56 = vadd.f32 %v1584_v51, %v297_v55 }
 0x53f   :  { %v1269_v57 = vpop.eup %1268 }
 0x540   :  { %1270 = vtanh.f32 %v298_v56  ;;  %390 = vrot.lane.b32.xlu0 %v1269_v57, %s1373_s18  ;;  %v1200_v60 = vmul.f32 -1.442695, %v298_v56 }
 0x541   :  { %1272 = vpow2.f32 %v1204_v59 }
 0x542   :  { %1274 = vpow2.f32 %v1200_v60 }
 0x546   :  { %v1271_v58 = vpop.eup %1270 }
 0x547   :  { %322 = vrot.lane.b32.xlu1 %v1271_v58, %s1373_s18  ;;  %v1273_v61 = vpop.eup %1272 }
 0x548   :  { %v371_v62 = vadd.f32 1.0, %v1273_v61  ;;  %v1275_v63 = vpop.eup %1274 }
 0x549   :  { %v303_v2 = vadd.f32 1.0, %v1275_v63 }
 0x54a   :  { %1276 = vrcp.f32 %v371_v62  ;;  %v383_v13 = vand.u32 2147483648, %v371_v62  ;;  %vm377_vm15 = vweird.f32 %v371_v62  ;;  %v381_v14 = vand.u32 2147483647, %v371_v62 }
 0x54b   :  { %1278 = vrcp.f32 %v303_v2  ;;  %v315_v22 = vand.u32 2147483648, %v303_v2  ;;  %vm309_vm4 = vweird.f32 %v303_v2  ;;  %v313_v23 = vand.u32 2147483647, %v303_v2 }
 0x54c   :  { %v384_v17 = vor.u32 1.1754944e-38, %v383_v13  ;;  %vm382_vm2 = vcmp.eq.f32.partialorder %v381_v14, 8.507059e+37 }
 0x54d   :  { %v316_v25 = vor.u32 1.1754944e-38, %v315_v22  ;;  %vm314_vm7 = vcmp.eq.f32.partialorder %v313_v23, 8.507059e+37 }
 0x550   :  { %v1277_v5 = vpop.eup %1276 }
 0x551   :  { %v373_v6 = vmul.f32 %v1277_v5, %v371_v62  ;;  %v1279_v7 = vpop.eup %1278  ;;  %vm378_vm14 = vweird.f32 %v1277_v5 }
 0x552   :  { %v305_v9 = vmul.f32 %v1279_v7, %v303_v2  ;;  %vm379_vm1 = vmor %vm377_vm15, %vm378_vm14  ;;  %vm310_vm3 = vweird.f32 %v1279_v7 }
 0x553   :  { %v374_v8 = vsub.f32 1.0, %v373_v6  ;;  %vm311_vm6 = vmor %vm309_vm4, %vm310_vm3 }
 0x554   :  { %v306_v11 = vsub.f32 1.0, %v305_v9 }
 0x555   :  { %v375_v10 = vmul.f32 %v1277_v5, %v374_v8 }
 0x556   :  { %v307_v15 = vmul.f32 %v1279_v7, %v306_v11 }
 0x557   :  { %v376_v12 = vadd.f32 %v1277_v5, %v375_v10 }
 0x558   :  { %v308_v20 = vadd.f32 %v1279_v7, %v307_v15 }
 0x559   :  { %v380_v16 = vsel %vm379_vm1, %v1277_v5, %v376_v12 }
 0x55a   :  { %v385_v19 = vsel %vm382_vm2, %v384_v17, %v380_v16  ;;  %v312_v24 = vsel %vm311_vm6, %v1279_v7, %v308_v20 }
 0x55b   :  { %v317_v27 = vsel %vm314_vm7, %v316_v25, %v312_v24  ;;  %v388_v29 = vmul.f32 %v385_v19, %v1592_v31 }
 0x55c   :  { %v320_v44 = vmul.f32 %v317_v27, %v1595_v37 }
 0x5b2   :  { %v391_v18 = vpop.permute.xlu0 %390 }
 0x5b3   :  { %v393_v21 = vmul.f32 %v391_v18, %v385_v19 }
 0x5b5   :  { %395 = vrot.lane.b32.xlu2 %v393_v21, %s1374_s19 }
 0x5b9   :  { %v323_v26 = vpop.permute.xlu1 %322 }
 0x5ba   :  { %v325_v28 = vmul.f32 %v323_v26, %v317_v27 }
 0x5bc   :  { %327 = vrot.lane.b32.xlu0 %v325_v28, %s1374_s19 }
 0x60f   :  { %v396_v32 = vpop.permute.xlu2 %395 }
 0x610   :  { %v1633_v36 = vadd.f32 %v396_v32, %v388_v29 }
 0x612   :  { %1280 = vtanh.f32 %v1633_v36 }
 0x618   :  { %v1281_v38 = vpop.eup %1280 }
 0x619   :  { %401 = vrot.lane.b32.xlu1 %v1281_v38, %s1373_s18 }
 0x62e   :  { %v328_v45 = vpop.permute.xlu0 %327 }
 0x62f   :  { %v1638_v30 = vadd.f32 %v328_v45, %v320_v44 }
 0x631   :  { %1282 = vtanh.f32 %v1638_v30 }
 0x637   :  { %v1283_v47 = vpop.eup %1282 }
 0x638   :  { %333 = vrot.lane.b32.xlu2 %v1283_v47, %s1373_s18 }
 0x68b   :  { %v402_v48 = vpop.permute.xlu1 %401 }
 0x68c   :  { %v404_v31 = vmul.f32 %v402_v48, %v385_v19 }
 0x68e   :  { %406 = vrot.lane.b32.xlu0 %v404_v31, %s1374_s19  ;;  %v1214_v31 = vld [vmem:[%s1865_s0 + $0x20] sm:$0xff] }
 0x692   :  { %v334_v49 = vpop.permute.xlu2 %333 }
 0x693   :  { %v1643_v50 = vmul.f32 %v334_v49, %v317_v27 }
 0x695   :  { %409 = vrot.lane.b32.xlu1 %v1643_v50, %s1373_s18 }
 0x700   :  { %v407_v52 = vpop.permute.xlu0 %406 }
 0x701   :  { %1209 = vmatmul.msk.f32.vlgmr.msra.gmra.mxu0 %vm32_vm0, %v407_v52 }
 0x702   :  { %1039 = vmatpush.msra.mxu0 %v1424_v0 }
 0x704   :  { %1040 = vmatpush.msra.mxu0 %v1429_v1 }
 0x706   :  { %1041 = vmatpush.msra.mxu0 %v1439_v3 }
 0x707   :  { %v410_v37 = vpop.permute.xlu1 %409 }
 0x708   :  { %v412_v53 = vsel %vm32_vm0, %v407_v52, %v410_v37  ;;  %1042 = vmatpush.msra.mxu0 %v1447_v4 }
 0x709   :  { %1205 = vmatmul.msk.f32.vlgmr.msrb.gmra.mxu2 %vm137_vm5, %v412_v53 }
 0x70a   :  { %968 = vmatpush.msrb.mxu2 %v1483_v33 }
 0x70c   :  { %969 = vmatpush.msrb.mxu2 %v1488_v34 }
 0x70e   :  { %970 = vmatpush.msrb.mxu2 %v1495_v35 }
 0x710   :  { %971 = vmatpush.msrb.mxu2 %v1509_v39 }
 0x712   :  { %972 = vmatpush.msrb.mxu2 %v1515_v40 }
 0x714   :  { %973 = vmatpush.msrb.mxu2 %v1521_v41 }
 0x716   :  { %974 = vmatpush.msrb.mxu2 %v1529_v42 }
 0x718   :  { %975 = vmatpush.msrb.mxu2 %v1540_v43 }
 0x77e   :  { %v500_v55 = vpop.f32.mrf.mxu0 }
 0x77f   :  { %v503_v33 = vadd.f32 %v1208_v54, %v500_v55 }
 0x781   :  { %1284 = vtanh.f32 %v503_v33  ;;  %v1210_v41 = vmul.f32 -1.442695, %v503_v33 }
 0x787   :  { %v1285_v34 = vpop.eup %1284 }
 0x788   :  { %526 = vrot.lane.b32.xlu2 %v1285_v34, %s1373_s18 }
 0x78c   :  { %v433_v35 = vpop.f32.mrf.mxu2 }
 0x78d   :  { %v434_v39 = vadd.f32 %v1584_v51, %v433_v35 }
 0x78f   :  { %1286 = vtanh.f32 %v434_v39  ;;  %v1206_v60 = vmul.f32 -1.442695, %v434_v39 }
 0x790   :  { %1288 = vpow2.f32 %v1210_v41 }
 0x795   :  { %v1287_v40 = vpop.eup %1286 }
 0x796   :  { %458 = vrot.lane.b32.xlu0 %v1287_v40, %s1373_s18  ;;  %v1289_v42 = vpop.eup %1288 }
 0x797   :  { %v507_v43 = vadd.f32 1.0, %v1289_v42 }
 0x799   :  { %1290 = vrcp.f32 %v507_v43  ;;  %v519_v62 = vand.u32 2147483648, %v507_v43  ;;  %vm513_vm9 = vweird.f32 %v507_v43  ;;  %v517_v63 = vand.u32 2147483647, %v507_v43 }
 0x79a   :  { %1292 = vpow2.f32 %v1206_v60 }
 0x79b   :  { %v520_v5 = vor.u32 1.1754944e-38, %v519_v62  ;;  %vm518_vm11 = vcmp.eq.f32.partialorder %v517_v63, 8.507059e+37 }
 0x79f   :  { %v1291_v56 = vpop.eup %1290 }
 0x7a0   :  { %v509_v57 = vmul.f32 %v1291_v56, %v507_v43  ;;  %vm514_vm8 = vweird.f32 %v1291_v56  ;;  %v1293_v9 = vpop.eup %1292 }
 0x7a1   :  { %vm515_vm10 = vmor %vm513_vm9, %vm514_vm8  ;;  %v439_v10 = vadd.f32 1.0, %v1293_v9 }
 0x7a2   :  { %v510_v58 = vsub.f32 1.0, %v509_v57 }
 0x7a3   :  { %1294 = vrcp.f32 %v439_v10  ;;  %v451_v16 = vand.u32 2147483648, %v439_v10  ;;  %vm445_vm13 = vweird.f32 %v439_v10  ;;  %v449_v17 = vand.u32 2147483647, %v439_v10 }
 0x7a4   :  { %v511_v59 = vmul.f32 %v1291_v56, %v510_v58 }
 0x7a5   :  { %v452_v19 = vor.u32 1.1754944e-38, %v451_v16  ;;  %vm450_vm15 = vcmp.eq.f32.partialorder %v449_v17, 8.507059e+37 }
 0x7a6   :  { %v512_v61 = vadd.f32 %v1291_v56, %v511_v59 }
 0x7a8   :  { %v516_v2 = vsel %vm515_vm10, %v1291_v56, %v512_v61 }
 0x7a9   :  { %v521_v6 = vsel %vm518_vm11, %v520_v5, %v516_v2  ;;  %v1295_v11 = vpop.eup %1294 }
 0x7aa   :  { %v441_v12 = vmul.f32 %v1295_v11, %v439_v10  ;;  %vm446_vm12 = vweird.f32 %v1295_v11  ;;  %v524_v23 = vmul.f32 %v521_v6, %v1633_v36 }
 0x7ab   :  { %vm447_vm14 = vmor %vm445_vm13, %vm446_vm12 }
 0x7ac   :  { %v442_v13 = vsub.f32 1.0, %v441_v12 }
 0x7ae   :  { %v443_v14 = vmul.f32 %v1295_v11, %v442_v13 }
 0x7b0   :  { %v444_v15 = vadd.f32 %v1295_v11, %v443_v14 }
 0x7b2   :  { %v448_v18 = vsel %vm447_vm14, %v1295_v11, %v444_v15 }
 0x7b3   :  { %v453_v21 = vsel %vm450_vm15, %v452_v19, %v448_v18 }
 0x7b4   :  { %v456_v27 = vmul.f32 %v453_v21, %v1638_v30 }
 0x7e2   :  { %v527_v7 = vpop.permute.xlu2 %526 }
 0x7e3   :  { %v529_v8 = vmul.f32 %v527_v7, %v521_v6 }
 0x7e5   :  { %531 = vrot.lane.b32.xlu1 %v529_v8, %s1374_s19 }
 0x808   :  { %v459_v20 = vpop.permute.xlu0 %458 }
 0x809   :  { %v461_v22 = vmul.f32 %v459_v20, %v453_v21 }
 0x80b   :  { %463 = vrot.lane.b32.xlu2 %v461_v22, %s1374_s19 }
 0x857   :  { %v532_v24 = vpop.permute.xlu1 %531 }
 0x858   :  { %v1671_v25 = vadd.f32 %v532_v24, %v524_v23 }
 0x85a   :  { %1296 = vtanh.f32 %v1671_v25 }
 0x860   :  { %v1297_v26 = vpop.eup %1296 }
 0x861   :  { %537 = vrot.lane.b32.xlu0 %v1297_v26, %s1373_s18 }
 0x865   :  { %v464_v28 = vpop.permute.xlu2 %463 }
 0x866   :  { %v1676_v29 = vadd.f32 %v464_v28, %v456_v27 }
 0x868   :  { %1298 = vtanh.f32 %v1676_v29 }
 0x86e   :  { %v1299_v32 = vpop.eup %1298 }
 0x86f   :  { %469 = vrot.lane.b32.xlu1 %v1299_v32, %s1373_s18 }
 0x8d3   :  { %v538_v38 = vpop.permute.xlu0 %537 }
 0x8d4   :  { %v540_v36 = vmul.f32 %v538_v38, %v521_v6 }
 0x8d6   :  { %542 = vrot.lane.b32.xlu2 %v540_v36, %s1374_s19 }
 0x8e1   :  { %v470_v44 = vpop.permute.xlu1 %469 }
 0x8e2   :  { %v1681_v45 = vmul.f32 %v470_v44, %v453_v21 }
 0x8e4   :  { %545 = vrot.lane.b32.xlu0 %v1681_v45, %s1373_s18 }
 0x930   :  { %v543_v47 = vpop.permute.xlu2 %542 }
 0x931   :  { %1215 = vmatmul.msk.f32.vlgmr.msrb.gmra.mxu3 %vm32_vm0, %v543_v47 }
 0x932   :  { %903 = vmatpush.msrb.mxu3 %v1424_v0 }
 0x934   :  { %904 = vmatpush.msrb.mxu3 %v1429_v1 }
 0x936   :  { %905 = vmatpush.msrb.mxu3 %v1439_v3 }
 0x938   :  { %906 = vmatpush.msrb.mxu3 %v1447_v4 }
 0x956   :  { %v546_v30 = vpop.permute.xlu0 %545 }
 0x957   :  { %v548_v48 = vsel %vm32_vm0, %v543_v47, %v546_v30 }
 0x958   :  { %1211 = vmatmul.msk.f32.vlgmr.msrb.gmra.mxu1 %vm137_vm5, %v548_v48 }
 0x9b4   :  { %v636_v49 = vpop.f32.mrf.mxu3 }
 0x9b5   :  { %v639_v52 = vadd.f32 %v1214_v31, %v636_v49 }
 0x9b7   :  { %1300 = vtanh.f32 %v639_v52  ;;  %v1216_v4 = vmul.f32 -1.442695, %v639_v52 }
 0x9bd   :  { %v1301_v37 = vpop.eup %1300 }
 0x9be   :  { %662 = vrot.lane.b32.xlu1 %v1301_v37, %s1373_s18 }
 0x9d5   :  { %v569_v0 = vpop.f32.mrf.mxu1 }
 0x9d6   :  { %v570_v1 = vadd.f32 %v1584_v51, %v569_v0 }
 0x9d8   :  { %1302 = vtanh.f32 %v570_v1  ;;  %v1212_v53 = vmul.f32 -1.442695, %v570_v1 }
 0x9d9   :  { %1304 = vpow2.f32 %v1216_v4 }
 0x9da   :  { %1306 = vpow2.f32 %v1212_v53 }
 0x9de   :  { %v1303_v3 = vpop.eup %1302 }
 0x9df   :  { %594 = vrot.lane.b32.xlu2 %v1303_v3, %s1373_s18  ;;  %v1305_v54 = vpop.eup %1304 }
 0x9e0   :  { %v643_v55 = vadd.f32 1.0, %v1305_v54  ;;  %v1307_v33 = vpop.eup %1306 }
 0x9e1   :  { %v575_v34 = vadd.f32 1.0, %v1307_v33 }
 0x9e2   :  { %1308 = vrcp.f32 %v643_v55  ;;  %v655_v57 = vand.u32 2147483648, %v643_v55  ;;  %vm649_vm2 = vweird.f32 %v643_v55  ;;  %v653_v59 = vand.u32 2147483647, %v643_v55 }
 0x9e3   :  { %1310 = vrcp.f32 %v575_v34  ;;  %v587_v7 = vand.u32 2147483648, %v575_v34  ;;  %vm581_vm7 = vweird.f32 %v575_v34  ;;  %v585_v8 = vand.u32 2147483647, %v575_v34 }
 0x9e4   :  { %v656_v61 = vor.u32 1.1754944e-38, %v655_v57  ;;  %vm654_vm4 = vcmp.eq.f32.partialorder %v653_v59, 8.507059e+37 }
 0x9e5   :  { %v588_v10 = vor.u32 1.1754944e-38, %v587_v7  ;;  %vm586_vm9 = vcmp.eq.f32.partialorder %v585_v8, 8.507059e+37 }
 0x9e8   :  { %v1309_v35 = vpop.eup %1308 }
 0x9e9   :  { %v645_v39 = vmul.f32 %v1309_v35, %v643_v55  ;;  %v1311_v41 = vpop.eup %1310  ;;  %vm650_vm1 = vweird.f32 %v1309_v35 }
 0x9ea   :  { %v577_v43 = vmul.f32 %v1311_v41, %v575_v34  ;;  %vm651_vm3 = vmor %vm649_vm2, %vm650_vm1  ;;  %vm582_vm6 = vweird.f32 %v1311_v41 }
 0x9eb   :  { %v646_v40 = vsub.f32 1.0, %v645_v39  ;;  %vm583_vm8 = vmor %vm581_vm7, %vm582_vm6 }
 0x9ec   :  { %v578_v58 = vsub.f32 1.0, %v577_v43 }
 0x9ed   :  { %v647_v42 = vmul.f32 %v1309_v35, %v646_v40 }
 0x9ee   :  { %v579_v62 = vmul.f32 %v1311_v41, %v578_v58 }
 0x9ef   :  { %v648_v56 = vadd.f32 %v1309_v35, %v647_v42 }
 0x9f0   :  { %v580_v6 = vadd.f32 %v1311_v41, %v579_v62 }
 0x9f1   :  { %v652_v60 = vsel %vm651_vm3, %v1309_v35, %v648_v56 }
 0x9f2   :  { %v657_v2 = vsel %vm654_vm4, %v656_v61, %v652_v60  ;;  %v584_v9 = vsel %vm583_vm8, %v1311_v41, %v580_v6 }
 0x9f3   :  { %v589_v12 = vsel %vm586_vm9, %v588_v10, %v584_v9  ;;  %v660_v14 = vmul.f32 %v657_v2, %v1671_v25 }
 0x9f4   :  { %v592_v17 = vmul.f32 %v589_v12, %v1676_v29  ;;  %v1220_v29 = vld [vmem:[%s1865_s0 + $0x28] sm:$0xff] }
 0xa30   :  { %v663_v63 = vpop.permute.xlu1 %662 }
 0xa31   :  { %v665_v5 = vmul.f32 %v663_v63, %v657_v2 }
 0xa33   :  { %667 = vrot.lane.b32.xlu0 %v665_v5, %s1374_s19 }
 0xa39   :  { %v595_v11 = vpop.permute.xlu2 %594 }
 0xa3a   :  { %v597_v13 = vmul.f32 %v595_v11, %v589_v12 }
 0xa3c   :  { %599 = vrot.lane.b32.xlu1 %v597_v13, %s1374_s19 }
 0xaa5   :  { %v668_v15 = vpop.permute.xlu0 %667 }
 0xaa6   :  { %v1701_v16 = vadd.f32 %v668_v15, %v660_v14 }
 0xaa8   :  { %1312 = vtanh.f32 %v1701_v16 }
 0xaae   :  { %v1313_v18 = vpop.eup %1312  ;;  %v600_v19 = vpop.permute.xlu1 %599 }
 0xaaf   :  { %v1705_v20 = vadd.f32 %v600_v19, %v592_v17  ;;  %673 = vrot.lane.b32.xlu2 %v1313_v18, %s1373_s18 }
 0xab1   :  { %1314 = vtanh.f32 %v1705_v20 }
 0xab7   :  { %v1315_v21 = vpop.eup %1314 }
 0xab8   :  { %605 = vrot.lane.b32.xlu0 %v1315_v21, %s1373_s18 }
 0xb09   :  { %v674_v22 = vpop.permute.xlu2 %673 }
 0xb0a   :  { %v676_v23 = vmul.f32 %v674_v22, %v657_v2 }
 0xb0c   :  { %678 = vrot.lane.b32.xlu1 %v676_v23, %s1374_s19  ;;  %v1226_v23 = vld [vmem:[%s1865_s0 + $0x30] sm:$0xff] }
 0xb2a   :  { %v606_v24 = vpop.permute.xlu0 %605 }
 0xb2b   :  { %v1711_v25 = vmul.f32 %v606_v24, %v589_v12 }
 0xb2d   :  { %681 = vrot.lane.b32.xlu2 %v1711_v25, %s1373_s18 }
 0xb7e   :  { %v679_v26 = vpop.permute.xlu1 %678 }
 0xb7f   :  { %1221 = vmatmul.msk.f32.vlgmr.msra.gmra.mxu2 %vm32_vm0, %v679_v26 }
 0xb87   :  { %v682_v27 = vpop.permute.xlu2 %681 }
 0xb88   :  { %v684_v28 = vsel %vm32_vm0, %v679_v26, %v682_v27 }
 0xb89   :  { %1217 = vmatmul.msk.f32.vlgmr.msrb.gmra.mxu0 %vm137_vm5, %v684_v28 }
 0xc02   :  { %v772_v32 = vpop.f32.mrf.mxu2 }
 0xc03   :  { %v775_v38 = vadd.f32 %v1220_v29, %v772_v32 }
 0xc05   :  { %1316 = vtanh.f32 %v775_v38  ;;  %v1222_v48 = vmul.f32 -1.442695, %v775_v38 }
 0xc06   :  { %v705_v36 = vpop.f32.mrf.mxu0 }
 0xc07   :  { %v706_v44 = vadd.f32 %v1584_v51, %v705_v36 }
 0xc09   :  { %1318 = vtanh.f32 %v706_v44  ;;  %v1218_v31 = vmul.f32 -1.442695, %v706_v44 }
 0xc0a   :  { %1320 = vpow2.f32 %v1222_v48 }
 0xc0b   :  { %v1317_v47 = vpop.eup %1316  ;;  %1322 = vpow2.f32 %v1218_v31 }
 0xc0c   :  { %798 = vrot.lane.b32.xlu1 %v1317_v47, %s1373_s18 }
 0xc0f   :  { %v1319_v30 = vpop.eup %1318 }
 0xc10   :  { %730 = vrot.lane.b32.xlu0 %v1319_v30, %s1373_s18  ;;  %v1321_v49 = vpop.eup %1320 }
 0xc11   :  { %v779_v52 = vadd.f32 1.0, %v1321_v49  ;;  %v1323_v37 = vpop.eup %1322 }
 0xc12   :  { %v711_v0 = vadd.f32 1.0, %v1323_v37 }
 0xc13   :  { %1324 = vrcp.f32 %v779_v52  ;;  %v791_v39 = vand.u32 2147483648, %v779_v52  ;;  %vm785_vm11 = vweird.f32 %v779_v52  ;;  %v789_v40 = vand.u32 2147483647, %v779_v52 }
 0xc14   :  { %1326 = vrcp.f32 %v711_v0  ;;  %v723_v56 = vand.u32 2147483648, %v711_v0  ;;  %vm717_vm15 = vweird.f32 %v711_v0  ;;  %v721_v57 = vand.u32 2147483647, %v711_v0 }
 0xc15   :  { %v792_v43 = vor.u32 1.1754944e-38, %v791_v39  ;;  %vm790_vm14 = vcmp.eq.f32.partialorder %v789_v40, 8.507059e+37 }
 0xc16   :  { %v724_v62 = vor.u32 1.1754944e-38, %v723_v56  ;;  %vm722_vm2 = vcmp.eq.f32.partialorder %v721_v57, 8.507059e+37 }
 0xc19   :  { %v1325_v1 = vpop.eup %1324 }
 0xc1a   :  { %v781_v3 = vmul.f32 %v1325_v1, %v779_v52  ;;  %v1327_v4 = vpop.eup %1326  ;;  %vm786_vm10 = vweird.f32 %v1325_v1 }
 0xc1b   :  { %v713_v54 = vmul.f32 %v1327_v4, %v711_v0  ;;  %vm787_vm12 = vmor %vm785_vm11, %vm786_vm10  ;;  %vm718_vm13 = vweird.f32 %v1327_v4 }
 0xc1c   :  { %v782_v53 = vsub.f32 1.0, %v781_v3  ;;  %vm719_vm1 = vmor %vm717_vm15, %vm718_vm13 }
 0xc1d   :  { %v714_v33 = vsub.f32 1.0, %v713_v54 }
 0xc1e   :  { %v783_v55 = vmul.f32 %v1325_v1, %v782_v53 }
 0xc1f   :  { %v715_v35 = vmul.f32 %v1327_v4, %v714_v33 }
 0xc20   :  { %v784_v34 = vadd.f32 %v1325_v1, %v783_v55 }
 0xc21   :  { %v716_v42 = vadd.f32 %v1327_v4, %v715_v35 }
 0xc22   :  { %v788_v41 = vsel %vm787_vm12, %v1325_v1, %v784_v34 }
 0xc23   :  { %v793_v59 = vsel %vm790_vm14, %v792_v43, %v788_v41  ;;  %v720_v61 = vsel %vm719_vm1, %v1327_v4, %v716_v42 }
 0xc24   :  { %v725_v2 = vsel %vm722_vm2, %v724_v62, %v720_v61  ;;  %v796_v10 = vmul.f32 %v793_v59, %v1701_v16 }
 0xc25   :  { %v728_v6 = vmul.f32 %v725_v2, %v1705_v20 }
 0xc7e   :  { %v799_v58 = vpop.permute.xlu1 %798 }
 0xc7f   :  { %v801_v60 = vmul.f32 %v799_v58, %v793_v59 }
 0xc81   :  { %803 = vrot.lane.b32.xlu0 %v801_v60, %s1374_s19 }
 0xc82   :  { %v731_v63 = vpop.permute.xlu0 %730 }
 0xc83   :  { %v733_v5 = vmul.f32 %v731_v63, %v725_v2 }
 0xc85   :  { %735 = vrot.lane.b32.xlu2 %v733_v5, %s1374_s19 }
 0xcdf   :  { %v736_v7 = vpop.permute.xlu2 %735 }
 0xce0   :  { %v1727_v8 = vadd.f32 %v736_v7, %v728_v6 }
 0xce2   :  { %1328 = vtanh.f32 %v1727_v8 }
 0xce8   :  { %v1329_v9 = vpop.eup %1328 }
 0xce9   :  { %741 = vrot.lane.b32.xlu1 %v1329_v9, %s1373_s18 }
 0xcf3   :  { %v804_v11 = vpop.permute.xlu0 %803 }
 0xcf4   :  { %v1732_v12 = vadd.f32 %v804_v11, %v796_v10 }
 0xcf6   :  { %1330 = vtanh.f32 %v1732_v12 }
 0xcfc   :  { %v1331_v13 = vpop.eup %1330 }
 0xcfd   :  { %809 = vrot.lane.b32.xlu2 %v1331_v13, %s1373_s18 }
 0xd57   :  { %v810_v14 = vpop.permute.xlu2 %809 }
 0xd58   :  { %v812_v15 = vmul.f32 %v810_v14, %v793_v59  ;;  %v1232_v14 = vld [vmem:[%s1865_s0 + $0x38] sm:$0xff] }
 0xd5a   :  { %814 = vrot.lane.b32.xlu0 %v812_v15, %s1374_s19 }
 0xd5b   :  { %v742_v17 = vpop.permute.xlu1 %741 }
 0xd5c   :  { %v1737_v18 = vmul.f32 %v742_v17, %v725_v2 }
 0xd5e   :  { %817 = vrot.lane.b32.xlu1 %v1737_v18, %s1373_s18 }
 0xdcc   :  { %v815_v19 = vpop.permute.xlu0 %814 }
 0xdd0   :  { %v818_v16 = vpop.permute.xlu1 %817 }
 0xdd1   :  { %v820_v20 = vsel %vm32_vm0, %v815_v19, %v818_v16 }
 0xdd2   :  { %1223 = vmatmul.msk.f32.vlgmr.msra.gmra.mxu3 %vm137_vm5, %v820_v20 }
 0xdda   :  { %1227 = vmatmul.msk.f32.vlgmr.msrb.gmra.mxu3 %vm32_vm0, %v815_v19 }
 0xe55   :  { %v841_v21 = vpop.f32.mrf.mxu3 }
 0xe56   :  { %v842_v22 = vadd.f32 %v1584_v51, %v841_v21 }
 0xe58   :  { %1332 = vtanh.f32 %v842_v22  ;;  %v1224_v29 = vmul.f32 -1.442695, %v842_v22 }
 0xe5d   :  { %v908_v24 = vpop.f32.mrf.mxu3 }
 0xe5e   :  { %v1333_v26 = vpop.eup %1332  ;;  %v911_v27 = vadd.f32 %v1226_v23, %v908_v24 }
 0xe5f   :  { %866 = vrot.lane.b32.xlu2 %v1333_v26, %s1373_s18 }
 0xe60   :  { %1334 = vtanh.f32 %v911_v27  ;;  %v1228_v30 = vmul.f32 -1.442695, %v911_v27 }
 0xe61   :  { %1336 = vpow2.f32 %v1224_v29 }
 0xe66   :  { %v1335_v28 = vpop.eup %1334 }
 0xe67   :  { %934 = vrot.lane.b32.xlu0 %v1335_v28, %s1373_s18  ;;  %v1337_v32 = vpop.eup %1336 }
 0xe68   :  { %v847_v38 = vadd.f32 1.0, %v1337_v32 }
 0xe6a   :  { %1338 = vrcp.f32 %v847_v38  ;;  %v859_v49 = vand.u32 2147483648, %v847_v38  ;;  %vm853_vm4 = vweird.f32 %v847_v38  ;;  %v857_v52 = vand.u32 2147483647, %v847_v38 }
 0xe6b   :  { %1340 = vpow2.f32 %v1228_v30 }
 0xe6c   :  { %v860_v1 = vor.u32 1.1754944e-38, %v859_v49  ;;  %vm858_vm7 = vcmp.eq.f32.partialorder %v857_v52, 8.507059e+37 }
 0xe70   :  { %v1339_v36 = vpop.eup %1338 }
 0xe71   :  { %v849_v44 = vmul.f32 %v1339_v36, %v847_v38  ;;  %vm854_vm3 = vweird.f32 %v1339_v36  ;;  %v1341_v37 = vpop.eup %1340 }
 0xe72   :  { %vm855_vm6 = vmor %vm853_vm4, %vm854_vm3  ;;  %v915_v3 = vadd.f32 1.0, %v1341_v37 }
 0xe73   :  { %v850_v47 = vsub.f32 1.0, %v849_v44 }
 0xe74   :  { %1342 = vrcp.f32 %v915_v3  ;;  %v927_v40 = vand.u32 2147483648, %v915_v3  ;;  %vm921_vm9 = vweird.f32 %v915_v3  ;;  %v925_v41 = vand.u32 2147483647, %v915_v3 }
 0xe75   :  { %v851_v48 = vmul.f32 %v1339_v36, %v850_v47 }
 0xe76   :  { %v928_v43 = vor.u32 1.1754944e-38, %v927_v40  ;;  %vm926_vm11 = vcmp.eq.f32.partialorder %v925_v41, 8.507059e+37 }
 0xe77   :  { %v852_v31 = vadd.f32 %v1339_v36, %v851_v48 }
 0xe79   :  { %v856_v0 = vsel %vm855_vm6, %v1339_v36, %v852_v31 }
 0xe7a   :  { %v861_v53 = vsel %vm858_vm7, %v860_v1, %v856_v0  ;;  %v1343_v55 = vpop.eup %1342 }
 0xe7b   :  { %v917_v33 = vmul.f32 %v1343_v55, %v915_v3  ;;  %vm922_vm8 = vweird.f32 %v1343_v55  ;;  %v864_v59 = vmul.f32 %v861_v53, %v1727_v8 }
 0xe7c   :  { %vm923_vm10 = vmor %vm921_vm9, %vm922_vm8 }
 0xe7d   :  { %v918_v34 = vsub.f32 1.0, %v917_v33 }
 0xe7f   :  { %v919_v35 = vmul.f32 %v1343_v55, %v918_v34 }
 0xe81   :  { %v920_v39 = vadd.f32 %v1343_v55, %v919_v35 }
 0xe83   :  { %v924_v42 = vsel %vm923_vm10, %v1343_v55, %v920_v39 }
 0xe84   :  { %v929_v57 = vsel %vm926_vm11, %v928_v43, %v924_v42 }
 0xe85   :  { %v932_v62 = vmul.f32 %v929_v57, %v1732_v12 }
 0xeb9   :  { %v867_v4 = vpop.permute.xlu2 %866 }
 0xeba   :  { %v869_v54 = vmul.f32 %v867_v4, %v861_v53 }
 0xebc   :  { %871 = vrot.lane.b32.xlu1 %v869_v54, %s1374_s19 }
 0xed9   :  { %v935_v56 = vpop.permute.xlu0 %934 }
 0xeda   :  { %v937_v58 = vmul.f32 %v935_v56, %v929_v57 }
 0xedc   :  { %939 = vrot.lane.b32.xlu2 %v937_v58, %s1374_s19 }
 0xf2e   :  { %v872_v60 = vpop.permute.xlu1 %871 }
 0xf2f   :  { %v1753_v61 = vadd.f32 %v872_v60, %v864_v59 }
 0xf31   :  { %1344 = vtanh.f32 %v1753_v61 }
 0xf36   :  { %v940_v63 = vpop.permute.xlu2 %939 }
 0xf37   :  { %v1345_v2 = vpop.eup %1344  ;;  %v1757_v5 = vadd.f32 %v940_v63, %v932_v62 }
 0xf38   :  { %877 = vrot.lane.b32.xlu0 %v1345_v2, %s1373_s18 }
 0xf39   :  { %1346 = vtanh.f32 %v1757_v5 }
 0xf3f   :  { %v1347_v6 = vpop.eup %1346 }
 0xf40   :  { %945 = vrot.lane.b32.xlu1 %v1347_v6, %s1373_s18 }
 0xfaa   :  { %v878_v7 = vpop.permute.xlu0 %877 }
 0xfab   :  { %v1762_v8 = vmul.f32 %v878_v7, %v861_v53 }
 0xfad   :  { %953 = vrot.lane.b32.xlu0 %v1762_v8, %s1373_s18 }
 0xfb2   :  { %v946_v9 = vpop.permute.xlu1 %945 }
 0xfb3   :  { %v948_v10 = vmul.f32 %v946_v9, %v929_v57  ;;  %v1372_v9 = vld [vmem:[%s1867_s5] ss:$0 sm:$0xff] }
 0xfb5   :  { %950 = vrot.lane.b32.xlu2 %v948_v10, %s1374_s19 }
0x100f   :  { %v951_v11 = vpop.permute.xlu2 %950 }
0x1010   :  { %1233 = vmatmul.msk.f32.vlgmr.msra.gmra.mxu0 %vm32_vm0, %v951_v11 }
0x101f   :  { %v954_v12 = vpop.permute.xlu0 %953 }
0x1020   :  { %v956_v13 = vsel %vm32_vm0, %v951_v11, %v954_v12 }
0x1021   :  { %1229 = vmatmul.msk.f32.vlgmr.msrb.gmra.mxu2 %vm137_vm5, %v956_v13 }
0x108d   :  { %v1044_v15 = vpop.f32.mrf.mxu0 }
0x108e   :  { %v1047_v17 = vadd.f32 %v1232_v14, %v1044_v15 }
0x1090   :  { %1348 = vtanh.f32 %v1047_v17  ;;  %v1234_v22 = vmul.f32 -1.442695, %v1047_v17 }
0x1096   :  { %v1349_v19 = vpop.eup %1348 }
0x1097   :  { %1070 = vrot.lane.b32.xlu2 %v1349_v19, %s1373_s18 }
0x10a4   :  { %v977_v16 = vpop.f32.mrf.mxu2 }
0x10a5   :  { %v978_v20 = vadd.f32 %v1584_v51, %v977_v16 }
0x10a7   :  { %1350 = vtanh.f32 %v978_v20  ;;  %v1230_v31 = vmul.f32 -1.442695, %v978_v20 }
0x10a8   :  { %1352 = vpow2.f32 %v1234_v22 }
0x10ad   :  { %v1351_v21 = vpop.eup %1350 }
0x10ae   :  { %1002 = vrot.lane.b32.xlu1 %v1351_v21, %s1373_s18  ;;  %v1353_v23 = vpop.eup %1352 }
0x10af   :  { %v1051_v24 = vadd.f32 1.0, %v1353_v23 }
0x10b1   :  { %1354 = vrcp.f32 %v1051_v24  ;;  %v1063_v38 = vand.u32 2147483648, %v1051_v24  ;;  %vm1057_vm13 = vweird.f32 %v1051_v24  ;;  %v1061_v36 = vand.u32 2147483647, %v1051_v24 }
0x10b2   :  { %1356 = vpow2.f32 %v1230_v31 }
0x10b3   :  { %v1064_v44 = vor.u32 1.1754944e-38, %v1063_v38  ;;  %vm1062_vm15 = vcmp.eq.f32.partialorder %v1061_v36, 8.507059e+37 }
0x10b7   :  { %v1355_v26 = vpop.eup %1354 }
0x10b8   :  { %v1053_v27 = vmul.f32 %v1355_v26, %v1051_v24  ;;  %vm1058_vm12 = vweird.f32 %v1355_v26  ;;  %v1357_v49 = vpop.eup %1356 }
0x10b9   :  { %vm1059_vm14 = vmor %vm1057_vm13, %vm1058_vm12  ;;  %v983_v52 = vadd.f32 1.0, %v1357_v49 }
0x10ba   :  { %v1054_v28 = vsub.f32 1.0, %v1053_v27 }
0x10bb   :  { %1358 = vrcp.f32 %v983_v52  ;;  %v995_v53 = vand.u32 2147483648, %v983_v52  ;;  %vm989_vm2 = vweird.f32 %v983_v52  ;;  %v993_v54 = vand.u32 2147483647, %v983_v52 }
0x10bc   :  { %v1055_v29 = vmul.f32 %v1355_v26, %v1054_v28 }
0x10bd   :  { %v996_v33 = vor.u32 1.1754944e-38, %v995_v53  ;;  %vm994_vm4 = vcmp.eq.f32.partialorder %v993_v54, 8.507059e+37 }
0x10be   :  { %v1056_v32 = vadd.f32 %v1355_v26, %v1055_v29 }
0x10c0   :  { %v1060_v51 = vsel %vm1059_vm14, %v1355_v26, %v1056_v32 }
0x10c1   :  { %v1065_v30 = vsel %vm1062_vm15, %v1064_v44, %v1060_v51  ;;  %v1359_v37 = vpop.eup %1358 }
0x10c2   :  { %v985_v0 = vmul.f32 %v1359_v37, %v983_v52  ;;  %vm990_vm1 = vweird.f32 %v1359_v37  ;;  %v1068_v40 = vmul.f32 %v1065_v30, %v1757_v5 }
0x10c3   :  { %vm991_vm3 = vmor %vm989_vm2, %vm990_vm1 }
0x10c4   :  { %v986_v1 = vsub.f32 1.0, %v985_v0 }
0x10c6   :  { %v987_v3 = vmul.f32 %v1359_v37, %v986_v1 }
0x10c8   :  { %v988_v4 = vadd.f32 %v1359_v37, %v987_v3 }
0x10ca   :  { %v992_v55 = vsel %vm991_vm3, %v1359_v37, %v988_v4 }
0x10cb   :  { %v997_v35 = vsel %vm994_vm4, %v996_v33, %v992_v55 }
0x10cc   :  { %v1000_v56 = vmul.f32 %v997_v35, %v1753_v61 }
0x10f1   :  { %v1071_v47 = vpop.permute.xlu2 %1070 }
0x10f2   :  { %v1073_v48 = vmul.f32 %v1071_v47, %v1065_v30 }
0x10f4   :  { %1075 = vrot.lane.b32.xlu1 %v1073_v48, %s1374_s19 }
0x1120   :  { %v1003_v34 = vpop.permute.xlu1 %1002 }
0x1121   :  { %v1005_v39 = vmul.f32 %v1003_v34, %v997_v35 }
0x1123   :  { %1007 = vrot.lane.b32.xlu0 %v1005_v39, %s1374_s19 }
0x1166   :  { %v1076_v41 = vpop.permute.xlu1 %1075 }
0x1167   :  { %v1779_v42 = vadd.f32 %v1076_v41, %v1068_v40 }
0x1169   :  { %1360 = vtanh.f32 %v1779_v42 }
0x116f   :  { %v1361_v43 = vpop.eup %1360 }
0x1170   :  { %1081 = vrot.lane.b32.xlu0 %v1361_v43, %s1373_s18 }
0x1195   :  { %v1008_v57 = vpop.permute.xlu0 %1007 }
0x1196   :  { %v1010_v58 = vadd.f32 %v1008_v57, %v1000_v56 }
0x1198   :  { %1362 = vtanh.f32 %v1010_v58 }
0x119e   :  { %v1363_v59 = vpop.eup %1362 }
0x119f   :  { %1013 = vrot.lane.b32.xlu2 %v1363_v59, %s1373_s18 }
0x11e2   :  { %v1082_v60 = vpop.permute.xlu0 %1081 }
0x11e3   :  { %v1084_v62 = vmul.f32 %v1082_v60, %v1065_v30 }
0x11e5   :  { %1086 = vrot.lane.b32.xlu1 %v1084_v62, %s1374_s19 }
0x11f9   :  { %v1014_v63 = vpop.permute.xlu2 %1013 }
0x11fa   :  { %v1016_v2 = vmul.f32 %v1014_v63, %v997_v35 }
0x11fc   :  { %1089 = vrot.lane.b32.xlu2 %v1016_v2, %s1373_s18 }
0x1256   :  { %v1090_v5 = vpop.permute.xlu2 %1089 }
0x1257   :  { %v1087_v6 = vpop.permute.xlu1 %1086 }
0x1258   :  { %v1092_v7 = vsel %vm32_vm0, %v1087_v6, %v1090_v5  ;;  %1159 = vst.msk [vmem:[#allocation2] sm:$0xff] %vm32_vm0, %v1087_v6 }
0x1259   :  { %1174 = vst.msk [vmem:[%s1868_s7] sm:$0xff] %vm32_vm0, %v1087_v6  ;;  %1235 = vmatmul.msk.f32.vlgmr.msra.gmra.mxu1 %vm137_vm5, %v1092_v7 }
0x12d6   :  { %v1113_v61 = vpop.f32.mrf.mxu1 }
0x12d7   :  { %v1114_v10 = vadd.f32 %v1372_v9, %v1113_v61 }
0x12d9   :  { %1364 = vtanh.f32 %v1114_v10  ;;  %v1236_v12 = vmul.f32 -1.442695, %v1114_v10 }
0x12db   :  { %1366 = vpow2.f32 %v1236_v12 }
0x12df   :  { %v1365_v11 = vpop.eup %1364 }
0x12e0   :  { %1138 = vrot.lane.b32.xlu0 %v1365_v11, %s1373_s18 }
0x12e1   :  { %v1367_v13 = vpop.eup %1366 }
0x12e2   :  { %v1119_v14 = vadd.f32 1.0, %v1367_v13 }
0x12e4   :  { %1368 = vrcp.f32 %v1119_v14  ;;  %v1131_v21 = vand.u32 2147483648, %v1119_v14  ;;  %vm1125_vm6 = vweird.f32 %v1119_v14  ;;  %v1129_v22 = vand.u32 2147483647, %v1119_v14 }
0x12e6   :  { %v1132_v23 = vor.u32 1.1754944e-38, %v1131_v21  ;;  %vm1130_vm8 = vcmp.eq.f32.partialorder %v1129_v22, 8.507059e+37 }
0x12e8   :  { %203 = vrot.lane.b32.xlu0 %v1600_v46, %s1374_s19 }
0x12ea   :  { %v1369_v15 = vpop.eup %1368 }
0x12eb   :  { %v1121_v17 = vmul.f32 %v1369_v15, %v1119_v14  ;;  %vm1126_vm5 = vweird.f32 %v1369_v15 }
0x12ec   :  { %vm1127_vm7 = vmor %vm1125_vm6, %vm1126_vm5 }
0x12ed   :  { %v1122_v19 = vsub.f32 1.0, %v1121_v17 }
0x12ef   :  { %v1123_v16 = vmul.f32 %v1369_v15, %v1122_v19 }
0x12f0   :  { %610 = vrot.lane.b32.xlu0 %v1711_v25, %s1374_s19 }
0x12f1   :  { %v1124_v20 = vadd.f32 %v1369_v15, %v1123_v16 }
0x12f3   :  { %v1128_v46 = vsel %vm1127_vm7, %v1369_v15, %v1124_v20 }
0x12f4   :  { %v1133_v24 = vsel %vm1130_vm8, %v1132_v23, %v1128_v46 }
0x12f5   :  { %v1136_v32 = vmul.f32 %v1133_v24, %v1010_v58 }
0x12f8   :  { %1018 = vrot.lane.b32.xlu0 %v1016_v2, %s1374_s19 }
0x1352   :  { %v1139_v25 = vpop.permute.xlu0 %1138 }
0x1353   :  { %v1141_v26 = vmul.f32 %v1139_v25, %v1133_v24 }
0x1355   :  { %1143 = vrot.lane.b32.xlu1 %v1141_v26, %s1374_s19 }
0x135a   :  { %v204_v27 = vpop.permute.xlu0 %203 }
0x135b   :  { %206 = vst.msk [vmem:[%s1869_s6] sm:$0xff] %vm32_vm0, %v204_v27 }
0x135d   :  { %338 = vrot.lane.b32.xlu1 %v1643_v50, %s1374_s19 }
0x1362   :  { %v611_v28 = vpop.permute.xlu0 %610 }
0x1363   :  { %1213 = vst.msk [vmem:[%s1869_s6 + $0x18] sm:$0xff] %vm32_vm0, %v611_v28 }
0x1365   :  { %746 = vrot.lane.b32.xlu1 %v1737_v18, %s1374_s19 }
0x136a   :  { %v1019_v29 = vpop.permute.xlu0 %1018 }
0x136b   :  { %1231 = vst.msk [vmem:[%s1869_s6 + $0x30] sm:$0xff] %vm32_vm0, %v1019_v29 }
0x13c7   :  { %v1144_v38 = vpop.permute.xlu1 %1143 }
0x13c8   :  { %v1146_v36 = vadd.f32 %v1144_v38, %v1136_v32 }
0x13ca   :  { %1370 = vtanh.f32 %v1146_v36  ;;  %1167 = vrot.lane.b32.xlu0 %v1146_v36, %s1375_s2 }
0x13cf   :  { %v339_v50 = vpop.permute.xlu1 %338 }
0x13d0   :  { %v1371_v51 = vpop.eup %1370  ;;  %1201 = vst.msk [vmem:[%s1869_s6 + $0x8] sm:$0xff] %vm32_vm0, %v339_v50 }
0x13d1   :  { %1149 = vrot.lane.b32.xlu2 %v1371_v51, %s1373_s18 }
0x13d7   :  { %v747_v18 = vpop.permute.xlu1 %746 }
0x13d8   :  { %1219 = vst.msk [vmem:[%s1869_s6 + $0x20] sm:$0xff] %vm32_vm0, %v747_v18 }
0x13d9   :  { %474 = vrot.lane.b32.xlu2 %v1681_v45, %s1374_s19 }
0x13e1   :  { %882 = vrot.lane.b32.xlu2 %v1762_v8, %s1374_s19 }
0x13e9   :  { %1162 = vrot.lane.b32.xlu2 %v1779_v42, %s1375_s2 }
0x142b   :  { %v1150_v44 = vpop.permute.xlu2 %1149 }
0x142c   :  { %v1152_v47 = vmul.f32 %v1150_v44, %v1133_v24 }
0x142e   :  { %1154 = vrot.lane.b32.xlu1 %v1152_v47, %s1374_s19 }
0x1433   :  { %v475_v30 = vpop.permute.xlu2 %474 }
0x1434   :  { %1207 = vst.msk [vmem:[%s1869_s6 + $0x10] sm:$0xff] %vm32_vm0, %v475_v30 }
0x143b   :  { %v883_v48 = vpop.permute.xlu2 %882 }
0x143c   :  { %1225 = vst.msk [vmem:[%s1869_s6 + $0x28] sm:$0xff] %vm32_vm0, %v883_v48  ;;  %v1168_v45 = vpop.permute.xlu0 %1167 }
0x143d   :  { %1170 = vst.msk [vmem:[#allocation3 + $0x8] sm:$0xff] %vm32_vm0, %v1168_v45 }
0x143e   :  { %1239 = vst.msk [vmem:[%s1870_s8 + $0x8] sm:$0xff] %vm32_vm0, %v1168_v45 }
0x1443   :  { %v1163_v8 = vpop.permute.xlu2 %1162 }
0x1444   :  { %1165 = vst.msk [vmem:[#allocation3] sm:$0xff] %vm32_vm0, %v1163_v8 }
0x1445   :  { %1177 = vst.msk [vmem:[%s1870_s8] sm:$0xff] %vm32_vm0, %v1163_v8 }
0x14a0   :  { %v1155_v31 = vpop.permute.xlu1 %1154 }
0x14a1   :  { %1237 = vst.msk [vmem:[%s1869_s6 + $0x38] sm:$0xff] %vm32_vm0, %v1155_v31 }
0x14a2   :  { %1160 = vst.msk [vmem:[#allocation2 + $0x8] sm:$0xff] %vm32_vm0, %v1155_v31 }
0x14a3   :  { %1238 = vst.msk [vmem:[%s1868_s7 + $0x8] sm:$0xff] %vm32_vm0, %v1155_v31 }

</bundles_post_ra>
